<compile_context>
chip_gen: v6e
topology: v6e:2x2x1
jax: 0.10.0
libtpu: 0.0.40
codegen_flags: <defaults>
</compile_context>

<pallas_src>
import functools

import jax
import jax.numpy as jnp
from jax import lax
from jax.experimental import pallas as pl
from jax.experimental.pallas import tpu as pltpu


def _layer_norm_fused(t, g, b, eps=1e-5):
    """Single-pass LayerNorm: var = E[x^2] - E[x]^2 (halves the XLU reduction passes)."""
    mu = jnp.mean(t, axis=-1, keepdims=True)
    ms = jnp.mean(t * t, axis=-1, keepdims=True)
    var = jnp.maximum(ms - mu * mu, 0.0)
    return (t - mu) * lax.rsqrt(var + eps) * g + b


def tattention_kernel(x_ref, wq_ref, wk_ref, wv_ref,
                      g1_ref, b1_ref, g12_ref, b12_ref,
                      g2_ref, b2_ref, g22_ref, b22_ref,
                      w1_ref, bb1_ref, w2_ref, bb2_ref,
                      out_ref, *, nhead, compute_dtype):
    Bt, S, D = x_ref.shape
    dh = D // nhead
    cd = compute_dtype

    # Flatten the batch tile so the Linear / FFN matmuls see (Bt*S, D) rows (MXU-shaped).
    x2 = x_ref[...].reshape(Bt * S, D).astype(jnp.float32)

    # norm1 (pre-norm branch of peri_norm).  LayerNorm stays in f32.
    xn = _layer_norm_fused(x2, g1_ref[...], b1_ref[...])

    # q/k/v projections (nn.Linear, bias=False); weights stored pre-transposed as (in, out).
    xn_c = xn.astype(cd)
    q = jnp.dot(xn_c, wq_ref[...].astype(cd), preferred_element_type=jnp.float32)
    k = jnp.dot(xn_c, wk_ref[...].astype(cd), preferred_element_type=jnp.float32)
    v = jnp.dot(xn_c, wv_ref[...].astype(cd), preferred_element_type=jnp.float32)

    q3 = q.reshape(Bt, S, D)
    k3 = k.reshape(Bt, S, D)
    v3 = v.reshape(Bt, S, D)

    # Per-head attention, batched over the batch tile (no transposes, no scratch stores):
    #   softmax(qh @ kh^T) @ vh      (NO 1/sqrt(dh) scaling, exactly as TAttention)
    # Exact softmax (no approximate reciprocal) so numerics match torch.softmax / the reference.
    heads = []
    for h in range(nhead):
        lo = h * dh
        qh = q3[:, :, lo:lo + dh].astype(cd)
        kh = k3[:, :, lo:lo + dh].astype(cd)
        vh = v3[:, :, lo:lo + dh].astype(cd)
        s = jnp.einsum('bqd,bkd->bqk', qh, kh,
                       preferred_element_type=jnp.float32)              # (Bt, S, S)
        s = s - jnp.max(s, axis=-1, keepdims=True)
        p = jnp.exp(s)
        p = p / jnp.sum(p, axis=-1, keepdims=True)
        heads.append(jnp.einsum('bqk,bkd->bqd', p.astype(cd), vh,
                                preferred_element_type=jnp.float32))     # (Bt, S, dh)
    att = jnp.concatenate(heads, axis=-1).reshape(Bt * S, D)

    # norm1_2, residual with the *normed* input, norm2.
    att = _layer_norm_fused(att, g12_ref[...], b12_ref[...])
    xt = _layer_norm_fused(xn + att, g2_ref[...], b2_ref[...])

    # FFN: Linear(D,D)+bias -> ReLU -> Linear(D,D)+bias (dropouts are identity in eval).
    h1 = jnp.dot(xt.astype(cd), w1_ref[...].astype(cd),
                 preferred_element_type=jnp.float32) + bb1_ref[...]
    h1 = jnp.maximum(h1, 0.0)
    ffn = jnp.dot(h1.astype(cd), w2_ref[...].astype(cd),
                  preferred_element_type=jnp.float32) + bb2_ref[...]

    # norm2_2 + final residual.
    ffn = _layer_norm_fused(ffn, g22_ref[...], b22_ref[...])
    out_ref[...] = (xt + ffn).reshape(Bt, S, D).astype(out_ref.dtype)


def _vmem_bytes_estimate(block_b, S, D, x_bytes=4, w_bytes=4):
    """Rough per-grid-step VMEM footprint (double-buffered IO + weights + live temporaries)."""
    rows = block_b * S
    io = 2 * 2 * rows * D * x_bytes                     # x in + out blocks, double-buffered
    consts = 2 * (5 * D * D * w_bytes + 10 * D * 4)     # 5 DxD weights + LN/bias vectors
    temps = 10 * rows * D * 4                           # xn/q/k/v/att/xt/h1/ffn + slack (f32)
    scores = 2 * block_b * S * S * 4                    # live per-head (S,S) f32 score tiles
    return io + consts + temps + scores


def _pick_block_b(B, S, D, *, target_rows=1024, vmem_budget_bytes=24 << 20,
                  prefer_multistep=True):
    """Largest divisor of B whose (block_b*S, D) row tile fits the VMEM budget.

    prefer_multistep keeps the grid >= 2 when possible so (a) "parallel" batch tiles can be
    sharded across the two v7x TensorCores and (b) the software pipeline can overlap DMA with
    compute.  target_rows ~1024 amortizes the ~0.35us per-grid-step overhead on all generations.
    """
    divisors = [d for d in range(1, B + 1) if B % d == 0]
    fits = [bb for bb in divisors
            if bb * S <= target_rows
            and _vmem_bytes_estimate(bb, S, D) <= vmem_budget_bytes]
    if not fits:
        fits = [1]
    if prefer_multistep:
        multi = [bb for bb in fits if B // bb >= 2]
        if multi:
            fits = multi
    return max(fits)


def tattention_forward(x, params, nhead, *, block_b=None,
                       compute_dtype=jnp.float32, weight_dtype=None):
    """TAttention forward.  For production d_model on v5e/v6e/v7x prefer
    compute_dtype=jnp.bfloat16 and weight_dtype=jnp.bfloat16 (f32 accumulation / f32 LayerNorm
    are preserved); defaults are f32 so the small-shape check matches the f32 reference exactly.
    Layout note: S (hence block_b*S) should ideally be a multiple of 8 and D a multiple of 128
    (256 on v6e/v7x) for lane-dense stores; correctness does not depend on it."""
    B, S, D = x.shape
    assert D % nhead == 0, "d_model must be divisible by nhead"
    if block_b is None:
        block_b = _pick_block_b(B, S, D)
    assert B % block_b == 0, "block_b must divide the batch size"

    if weight_dtype is not None:
        params = dict(params)
        for name in ("wq", "wk", "wv", "w1", "w2"):
            params[name] = params[name].astype(weight_dtype)

    w_bytes = jnp.dtype(params["wq"].dtype).itemsize
    vmem_limit = int(min(max(1.5 * _vmem_bytes_estimate(block_b, S, D, w_bytes=w_bytes),
                             32 << 20), 64 << 20))

    kernel = functools.partial(tattention_kernel, nhead=nhead, compute_dtype=compute_dtype)

    vec_spec = pl.BlockSpec((1, D), lambda b: (0, 0))        # LN params / FFN biases
    mat_spec = pl.BlockSpec((D, D), lambda b: (0, 0))        # weight matrices (constant index)
    x_spec = pl.BlockSpec((block_b, S, D), lambda b: (b, 0, 0))

    in_specs = [
        x_spec,
        mat_spec, mat_spec, mat_spec,            # wq, wk, wv (already (in, out))
        vec_spec, vec_spec, vec_spec, vec_spec,  # norm1 g/b, norm1_2 g/b
        vec_spec, vec_spec, vec_spec, vec_spec,  # norm2 g/b, norm2_2 g/b
        mat_spec, vec_spec, mat_spec, vec_spec,  # ffn w1, b1, w2, b2
    ]

    return pl.pallas_call(
        kernel,
        out_shape=jax.ShapeDtypeStruct((B, S, D), x.dtype),
        grid_spec=pltpu.PrefetchScalarGridSpec(
            num_scalar_prefetch=0,
            grid=(B // block_b,),
            in_specs=in_specs,
            out_specs=x_spec,
        ),
        compiler_params=pltpu.CompilerParams(
            dimension_semantics=("parallel",),
            vmem_limit_bytes=vmem_limit),
    )(x,
      params["wq"], params["wk"], params["wv"],
      params["g1"], params["b1"], params["g12"], params["b12"],
      params["g2"], params["b2"], params["g22"], params["b22"],
      params["w1"], params["bb1"], params["w2"], params["bb2"])


# ------------------------ pure-JAX reference (for verification) ------------------------
def tattention_ref(x, params, nhead):
    hp = lax.Precision.HIGHEST
    D = x.shape[-1]
    dh = D // nhead

    def ln(t, g, b, eps=1e-5):   # faithful two-pass LayerNorm (PyTorch semantics)
        mu = jnp.mean(t, axis=-1, keepdims=True)
        var = jnp.mean((t - mu) ** 2, axis=-1, keepdims=True)
        return (t - mu) / jnp.sqrt(var + eps) * g + b

    xn = ln(x, params["g1"], params["b1"])
    q = jnp.dot(xn, params["wq"], precision=hp)
    k = jnp.dot(xn, params["wk"], precision=hp)
    v = jnp.dot(xn, params["wv"], precision=hp)
    heads = []
    for i in range(nhead):
        qh = q[..., i * dh:(i + 1) * dh]
        kh = k[..., i * dh:(i + 1) * dh]
        vh = v[..., i * dh:(i + 1) * dh]
        s = jnp.einsum("bqd,bkd->bqk", qh, kh, precision=hp)
        p = jax.nn.softmax(s, axis=-1)
        heads.append(jnp.einsum("bqk,bkd->bqd", p, vh, precision=hp))
    att = jnp.concatenate(heads, axis=-1)
    att = ln(att, params["g12"], params["b12"])
    xt = ln(xn + att, params["g2"], params["b2"])
    h = jnp.maximum(jnp.dot(xt, params["w1"], precision=hp) + params["bb1"], 0.0)
    ffn = jnp.dot(h, params["w2"], precision=hp) + params["bb2"]
    ffn = ln(ffn, params["g22"], params["b22"])
    return xt + ffn


def init_params(key, d_model):
    ks = jax.random.split(key, 8)
    bound = 1.0 / jnp.sqrt(d_model)

    def u(k, shape):
        return jax.random.uniform(k, shape, jnp.float32, -bound, bound)

    return {
        # linear weights stored pre-transposed as (in, out) = (d_model, d_model)
        "wq": u(ks[0], (d_model, d_model)),
        "wk": u(ks[1], (d_model, d_model)),
        "wv": u(ks[2], (d_model, d_model)),
        "w1": u(ks[3], (d_model, d_model)),
        "bb1": u(ks[4], (1, d_model)),
        "w2": u(ks[5], (d_model, d_model)),
        "bb2": u(ks[6], (1, d_model)),
        # LayerNorm params: gamma=1, beta=0 (PyTorch default init)
        "g1": jnp.ones((1, d_model), jnp.float32),
        "b1": jnp.zeros((1, d_model), jnp.float32),
        "g12": jnp.ones((1, d_model), jnp.float32),
        "b12": jnp.zeros((1, d_model), jnp.float32),
        "g2": jnp.ones((1, d_model), jnp.float32),
        "b2": jnp.zeros((1, d_model), jnp.float32),
        "g22": jnp.ones((1, d_model), jnp.float32),
        "b22": jnp.zeros((1, d_model), jnp.float32),
    }


if __name__ == "__main__":
    B, S, D, NHEAD = 2, 8, 32, 4
    key = jax.random.PRNGKey(0)
    kx, kp = jax.random.split(key)
    x = jax.random.normal(kx, (B, S, D), dtype=jnp.float32)
    params = init_params(kp, D)

    out = tattention_forward(x, params, NHEAD)
    out = jax.block_until_ready(out)

    ref = tattention_ref(x, params, NHEAD)
    assert out.shape == (B, S, D)
    assert bool(jnp.all(jnp.isfinite(out)))
    # 1e-2 tolerance accommodates MXU f32 matmul precision on real hardware; the diff is ~1e-6
    # in interpret mode and structural bugs would produce O(1) errors.
    max_diff = float(jnp.max(jnp.abs(out - ref)))
    assert jnp.allclose(out, ref, rtol=1e-2, atol=1e-2), (
        f"mismatch vs pure-JAX reference (max abs diff = {max_diff})")

    print("KERNEL_OK")
</pallas_src>

<mosaic_0001>
module attributes {stable_mosaic.version = 11 : i64} {
  func.func @tattention_kernel(%arg0: i32, %arg1: memref<1x8x32xf32, #tpu.memory_space<vmem>>, %arg2: memref<32x32xf32, #tpu.memory_space<vmem>>, %arg3: memref<32x32xf32, #tpu.memory_space<vmem>>, %arg4: memref<32x32xf32, #tpu.memory_space<vmem>>, %arg5: memref<1x32xf32, #tpu.memory_space<vmem>>, %arg6: memref<1x32xf32, #tpu.memory_space<vmem>>, %arg7: memref<1x32xf32, #tpu.memory_space<vmem>>, %arg8: memref<1x32xf32, #tpu.memory_space<vmem>>, %arg9: memref<1x32xf32, #tpu.memory_space<vmem>>, %arg10: memref<1x32xf32, #tpu.memory_space<vmem>>, %arg11: memref<1x32xf32, #tpu.memory_space<vmem>>, %arg12: memref<1x32xf32, #tpu.memory_space<vmem>>, %arg13: memref<32x32xf32, #tpu.memory_space<vmem>>, %arg14: memref<1x32xf32, #tpu.memory_space<vmem>>, %arg15: memref<32x32xf32, #tpu.memory_space<vmem>>, %arg16: memref<1x32xf32, #tpu.memory_space<vmem>>, %arg17: memref<1x8x32xf32, #tpu.memory_space<vmem>>) attributes {dimension_semantics = [#tpu.dimension_semantics<parallel>], iteration_bounds = array<i64: 2>, scalar_prefetch = 0 : i64, scratch_operands = 0 : i64, tpu.core_type = #tpu.core_type<tc>, window_params = [{transform_indices = @transform_0, window_bounds = array<i64: 1, 8, 32>}, {pipeline_mode = #tpu.pipeline_mode<synchronous>, transform_indices = @transform_1, window_bounds = array<i64: 32, 32>}, {pipeline_mode = #tpu.pipeline_mode<synchronous>, transform_indices = @transform_2, window_bounds = array<i64: 32, 32>}, {pipeline_mode = #tpu.pipeline_mode<synchronous>, transform_indices = @transform_3, window_bounds = array<i64: 32, 32>}, {pipeline_mode = #tpu.pipeline_mode<synchronous>, transform_indices = @transform_4, window_bounds = array<i64: 1, 32>}, {pipeline_mode = #tpu.pipeline_mode<synchronous>, transform_indices = @transform_5, window_bounds = array<i64: 1, 32>}, {pipeline_mode = #tpu.pipeline_mode<synchronous>, transform_indices = @transform_6, window_bounds = array<i64: 1, 32>}, {pipeline_mode = #tpu.pipeline_mode<synchronous>, transform_indices = @transform_7, window_bounds = array<i64: 1, 32>}, {pipeline_mode = #tpu.pipeline_mode<synchronous>, transform_indices = @transform_8, window_bounds = array<i64: 1, 32>}, {pipeline_mode = #tpu.pipeline_mode<synchronous>, transform_indices = @transform_9, window_bounds = array<i64: 1, 32>}, {pipeline_mode = #tpu.pipeline_mode<synchronous>, transform_indices = @transform_10, window_bounds = array<i64: 1, 32>}, {pipeline_mode = #tpu.pipeline_mode<synchronous>, transform_indices = @transform_11, window_bounds = array<i64: 1, 32>}, {pipeline_mode = #tpu.pipeline_mode<synchronous>, transform_indices = @transform_12, window_bounds = array<i64: 32, 32>}, {pipeline_mode = #tpu.pipeline_mode<synchronous>, transform_indices = @transform_13, window_bounds = array<i64: 1, 32>}, {pipeline_mode = #tpu.pipeline_mode<synchronous>, transform_indices = @transform_14, window_bounds = array<i64: 32, 32>}, {pipeline_mode = #tpu.pipeline_mode<synchronous>, transform_indices = @transform_15, window_bounds = array<i64: 1, 32>}, {transform_indices = @transform_16, window_bounds = array<i64: 1, 8, 32>}]} {
    %c0 = arith.constant 0 : index
    %c0_0 = arith.constant 0 : index
    %c0_1 = arith.constant 0 : index
    %0 = vector.load %arg1[%c0, %c0_0, %c0_1] : memref<1x8x32xf32, #tpu.memory_space<vmem>>, vector<1x8x32xf32>
    %1 = vector.shape_cast %0 : vector<1x8x32xf32> to vector<8x32xf32>
    %c0_2 = arith.constant 0 : index
    %c0_3 = arith.constant 0 : index
    %2 = vector.load %arg5[%c0_2, %c0_3] : memref<1x32xf32, #tpu.memory_space<vmem>>, vector<1x32xf32>
    %c0_4 = arith.constant 0 : index
    %c0_5 = arith.constant 0 : index
    %3 = vector.load %arg6[%c0_4, %c0_5] : memref<1x32xf32, #tpu.memory_space<vmem>>, vector<1x32xf32>
    %cst = arith.constant dense<0.000000e+00> : vector<8xf32>
    %4 = vector.multi_reduction <add>, %1, %cst [1] : vector<8x32xf32> to vector<8xf32>
    %5 = vector.shape_cast %4 : vector<8xf32> to vector<8x1xf32>
    %cst_6 = arith.constant 3.200000e+01 : f32
    %6 = vector.broadcast %cst_6 : f32 to vector<8x1xf32>
    %7 = arith.divf %5, %6 : vector<8x1xf32>
    %8 = arith.mulf %1, %1 : vector<8x32xf32>
    %cst_7 = arith.constant dense<0.000000e+00> : vector<8xf32>
    %9 = vector.multi_reduction <add>, %8, %cst_7 [1] : vector<8x32xf32> to vector<8xf32>
    %10 = vector.shape_cast %9 : vector<8xf32> to vector<8x1xf32>
    %cst_8 = arith.constant 3.200000e+01 : f32
    %11 = vector.broadcast %cst_8 : f32 to vector<8x1xf32>
    %12 = arith.divf %10, %11 : vector<8x1xf32>
    %13 = arith.mulf %7, %7 : vector<8x1xf32>
    %14 = arith.subf %12, %13 : vector<8x1xf32>
    %cst_9 = arith.constant 0.000000e+00 : f32
    %15 = vector.broadcast %cst_9 : f32 to vector<8x1xf32>
    %16 = arith.maximumf %14, %15 : vector<8x1xf32>
    %17 = vector.broadcast %7 : vector<8x1xf32> to vector<8x32xf32>
    %18 = arith.subf %1, %17 : vector<8x32xf32>
    %cst_10 = arith.constant 9.99999974E-6 : f32
    %19 = vector.broadcast %cst_10 : f32 to vector<8x1xf32>
    %20 = arith.addf %16, %19 : vector<8x1xf32>
    %21 = math.rsqrt %20 : vector<8x1xf32>
    %22 = vector.broadcast %21 : vector<8x1xf32> to vector<8x32xf32>
    %23 = arith.mulf %18, %22 : vector<8x32xf32>
    %24 = vector.broadcast %2 : vector<1x32xf32> to vector<8x32xf32>
    %25 = arith.mulf %23, %24 : vector<8x32xf32>
    %26 = vector.broadcast %3 : vector<1x32xf32> to vector<8x32xf32>
    %27 = arith.addf %25, %26 : vector<8x32xf32>
    %c0_11 = arith.constant 0 : index
    %c0_12 = arith.constant 0 : index
    %28 = vector.load %arg2[%c0_11, %c0_12] : memref<32x32xf32, #tpu.memory_space<vmem>>, vector<32x32xf32>
    %cst_13 = arith.constant dense<0.000000e+00> : vector<8x32xf32>
    %29 = tpu.matmul %27, %28, %cst_13 {dimension_numbers = #tpu.dot_dimension_numbers<[1], [0], [0], [1], [0, 0, 1, 1], [], []>} : vector<8x32xf32>, vector<32x32xf32>, vector<8x32xf32> -> vector<8x32xf32>
    %c0_14 = arith.constant 0 : index
    %c0_15 = arith.constant 0 : index
    %30 = vector.load %arg3[%c0_14, %c0_15] : memref<32x32xf32, #tpu.memory_space<vmem>>, vector<32x32xf32>
    %cst_16 = arith.constant dense<0.000000e+00> : vector<8x32xf32>
    %31 = tpu.matmul %27, %30, %cst_16 {dimension_numbers = #tpu.dot_dimension_numbers<[1], [0], [0], [1], [0, 0, 1, 1], [], []>} : vector<8x32xf32>, vector<32x32xf32>, vector<8x32xf32> -> vector<8x32xf32>
    %c0_17 = arith.constant 0 : index
    %c0_18 = arith.constant 0 : index
    %32 = vector.load %arg4[%c0_17, %c0_18] : memref<32x32xf32, #tpu.memory_space<vmem>>, vector<32x32xf32>
    %cst_19 = arith.constant dense<0.000000e+00> : vector<8x32xf32>
    %33 = tpu.matmul %27, %32, %cst_19 {dimension_numbers = #tpu.dot_dimension_numbers<[1], [0], [0], [1], [0, 0, 1, 1], [], []>} : vector<8x32xf32>, vector<32x32xf32>, vector<8x32xf32> -> vector<8x32xf32>
    %34 = vector.shape_cast %29 : vector<8x32xf32> to vector<1x8x32xf32>
    %35 = vector.shape_cast %31 : vector<8x32xf32> to vector<1x8x32xf32>
    %36 = vector.shape_cast %33 : vector<8x32xf32> to vector<1x8x32xf32>
    %37 = vector.extract_strided_slice %34 {offsets = [0, 0, 0], sizes = [1, 8, 8], strides = [1, 1, 1]} : vector<1x8x32xf32> to vector<1x8x8xf32>
    %38 = vector.extract_strided_slice %35 {offsets = [0, 0, 0], sizes = [1, 8, 8], strides = [1, 1, 1]} : vector<1x8x32xf32> to vector<1x8x8xf32>
    %39 = vector.extract_strided_slice %36 {offsets = [0, 0, 0], sizes = [1, 8, 8], strides = [1, 1, 1]} : vector<1x8x32xf32> to vector<1x8x8xf32>
    "tpu.trace_start"() <{level = 10 : i32, message = "bqd,bkd->bqk"}> : () -> ()
    %cst_20 = arith.constant dense<0.000000e+00> : vector<1x8x8xf32>
    %40 = tpu.matmul %37, %38, %cst_20 {dimension_numbers = #tpu.dot_dimension_numbers<[2], [2], [1], [1], [0, 0, 0, 1, 1, 1], [0], [0]>} : vector<1x8x8xf32>, vector<1x8x8xf32>, vector<1x8x8xf32> -> vector<1x8x8xf32>
    "tpu.trace_stop"() : () -> ()
    %cst_21 = arith.constant dense<0xFF800000> : vector<1x8xf32>
    %41 = vector.multi_reduction <maximumf>, %40, %cst_21 [2] : vector<1x8x8xf32> to vector<1x8xf32>
    %42 = vector.shape_cast %41 : vector<1x8xf32> to vector<1x8x1xf32>
    %43 = vector.broadcast %42 : vector<1x8x1xf32> to vector<1x8x8xf32>
    %44 = arith.subf %40, %43 : vector<1x8x8xf32>
    %45 = math.exp %44 : vector<1x8x8xf32>
    %cst_22 = arith.constant dense<0.000000e+00> : vector<1x8xf32>
    %46 = vector.multi_reduction <add>, %45, %cst_22 [2] : vector<1x8x8xf32> to vector<1x8xf32>
    %47 = vector.shape_cast %46 : vector<1x8xf32> to vector<1x8x1xf32>
    %48 = vector.broadcast %47 : vector<1x8x1xf32> to vector<1x8x8xf32>
    %49 = arith.divf %45, %48 : vector<1x8x8xf32>
    "tpu.trace_start"() <{level = 10 : i32, message = "bqk,bkd->bqd"}> : () -> ()
    %cst_23 = arith.constant dense<0.000000e+00> : vector<1x8x8xf32>
    %50 = tpu.matmul %49, %39, %cst_23 {dimension_numbers = #tpu.dot_dimension_numbers<[2], [1], [1], [2], [0, 0, 0, 1, 1, 2], [0], [0]>} : vector<1x8x8xf32>, vector<1x8x8xf32>, vector<1x8x8xf32> -> vector<1x8x8xf32>
    "tpu.trace_stop"() : () -> ()
    %51 = vector.extract_strided_slice %34 {offsets = [0, 0, 8], sizes = [1, 8, 8], strides = [1, 1, 1]} : vector<1x8x32xf32> to vector<1x8x8xf32>
    %52 = vector.extract_strided_slice %35 {offsets = [0, 0, 8], sizes = [1, 8, 8], strides = [1, 1, 1]} : vector<1x8x32xf32> to vector<1x8x8xf32>
    %53 = vector.extract_strided_slice %36 {offsets = [0, 0, 8], sizes = [1, 8, 8], strides = [1, 1, 1]} : vector<1x8x32xf32> to vector<1x8x8xf32>
    "tpu.trace_start"() <{level = 10 : i32, message = "bqd,bkd->bqk"}> : () -> ()
    %cst_24 = arith.constant dense<0.000000e+00> : vector<1x8x8xf32>
    %54 = tpu.matmul %51, %52, %cst_24 {dimension_numbers = #tpu.dot_dimension_numbers<[2], [2], [1], [1], [0, 0, 0, 1, 1, 1], [0], [0]>} : vector<1x8x8xf32>, vector<1x8x8xf32>, vector<1x8x8xf32> -> vector<1x8x8xf32>
    "tpu.trace_stop"() : () -> ()
    %cst_25 = arith.constant dense<0xFF800000> : vector<1x8xf32>
    %55 = vector.multi_reduction <maximumf>, %54, %cst_25 [2] : vector<1x8x8xf32> to vector<1x8xf32>
    %56 = vector.shape_cast %55 : vector<1x8xf32> to vector<1x8x1xf32>
    %57 = vector.broadcast %56 : vector<1x8x1xf32> to vector<1x8x8xf32>
    %58 = arith.subf %54, %57 : vector<1x8x8xf32>
    %59 = math.exp %58 : vector<1x8x8xf32>
    %cst_26 = arith.constant dense<0.000000e+00> : vector<1x8xf32>
    %60 = vector.multi_reduction <add>, %59, %cst_26 [2] : vector<1x8x8xf32> to vector<1x8xf32>
    %61 = vector.shape_cast %60 : vector<1x8xf32> to vector<1x8x1xf32>
    %62 = vector.broadcast %61 : vector<1x8x1xf32> to vector<1x8x8xf32>
    %63 = arith.divf %59, %62 : vector<1x8x8xf32>
    "tpu.trace_start"() <{level = 10 : i32, message = "bqk,bkd->bqd"}> : () -> ()
    %cst_27 = arith.constant dense<0.000000e+00> : vector<1x8x8xf32>
    %64 = tpu.matmul %63, %53, %cst_27 {dimension_numbers = #tpu.dot_dimension_numbers<[2], [1], [1], [2], [0, 0, 0, 1, 1, 2], [0], [0]>} : vector<1x8x8xf32>, vector<1x8x8xf32>, vector<1x8x8xf32> -> vector<1x8x8xf32>
    "tpu.trace_stop"() : () -> ()
    %65 = vector.extract_strided_slice %34 {offsets = [0, 0, 16], sizes = [1, 8, 8], strides = [1, 1, 1]} : vector<1x8x32xf32> to vector<1x8x8xf32>
    %66 = vector.extract_strided_slice %35 {offsets = [0, 0, 16], sizes = [1, 8, 8], strides = [1, 1, 1]} : vector<1x8x32xf32> to vector<1x8x8xf32>
    %67 = vector.extract_strided_slice %36 {offsets = [0, 0, 16], sizes = [1, 8, 8], strides = [1, 1, 1]} : vector<1x8x32xf32> to vector<1x8x8xf32>
    "tpu.trace_start"() <{level = 10 : i32, message = "bqd,bkd->bqk"}> : () -> ()
    %cst_28 = arith.constant dense<0.000000e+00> : vector<1x8x8xf32>
    %68 = tpu.matmul %65, %66, %cst_28 {dimension_numbers = #tpu.dot_dimension_numbers<[2], [2], [1], [1], [0, 0, 0, 1, 1, 1], [0], [0]>} : vector<1x8x8xf32>, vector<1x8x8xf32>, vector<1x8x8xf32> -> vector<1x8x8xf32>
    "tpu.trace_stop"() : () -> ()
    %cst_29 = arith.constant dense<0xFF800000> : vector<1x8xf32>
    %69 = vector.multi_reduction <maximumf>, %68, %cst_29 [2] : vector<1x8x8xf32> to vector<1x8xf32>
    %70 = vector.shape_cast %69 : vector<1x8xf32> to vector<1x8x1xf32>
    %71 = vector.broadcast %70 : vector<1x8x1xf32> to vector<1x8x8xf32>
    %72 = arith.subf %68, %71 : vector<1x8x8xf32>
    %73 = math.exp %72 : vector<1x8x8xf32>
    %cst_30 = arith.constant dense<0.000000e+00> : vector<1x8xf32>
    %74 = vector.multi_reduction <add>, %73, %cst_30 [2] : vector<1x8x8xf32> to vector<1x8xf32>
    %75 = vector.shape_cast %74 : vector<1x8xf32> to vector<1x8x1xf32>
    %76 = vector.broadcast %75 : vector<1x8x1xf32> to vector<1x8x8xf32>
    %77 = arith.divf %73, %76 : vector<1x8x8xf32>
    "tpu.trace_start"() <{level = 10 : i32, message = "bqk,bkd->bqd"}> : () -> ()
    %cst_31 = arith.constant dense<0.000000e+00> : vector<1x8x8xf32>
    %78 = tpu.matmul %77, %67, %cst_31 {dimension_numbers = #tpu.dot_dimension_numbers<[2], [1], [1], [2], [0, 0, 0, 1, 1, 2], [0], [0]>} : vector<1x8x8xf32>, vector<1x8x8xf32>, vector<1x8x8xf32> -> vector<1x8x8xf32>
    "tpu.trace_stop"() : () -> ()
    %79 = vector.extract_strided_slice %34 {offsets = [0, 0, 24], sizes = [1, 8, 8], strides = [1, 1, 1]} : vector<1x8x32xf32> to vector<1x8x8xf32>
    %80 = vector.extract_strided_slice %35 {offsets = [0, 0, 24], sizes = [1, 8, 8], strides = [1, 1, 1]} : vector<1x8x32xf32> to vector<1x8x8xf32>
    %81 = vector.extract_strided_slice %36 {offsets = [0, 0, 24], sizes = [1, 8, 8], strides = [1, 1, 1]} : vector<1x8x32xf32> to vector<1x8x8xf32>
    "tpu.trace_start"() <{level = 10 : i32, message = "bqd,bkd->bqk"}> : () -> ()
    %cst_32 = arith.constant dense<0.000000e+00> : vector<1x8x8xf32>
    %82 = tpu.matmul %79, %80, %cst_32 {dimension_numbers = #tpu.dot_dimension_numbers<[2], [2], [1], [1], [0, 0, 0, 1, 1, 1], [0], [0]>} : vector<1x8x8xf32>, vector<1x8x8xf32>, vector<1x8x8xf32> -> vector<1x8x8xf32>
    "tpu.trace_stop"() : () -> ()
    %cst_33 = arith.constant dense<0xFF800000> : vector<1x8xf32>
    %83 = vector.multi_reduction <maximumf>, %82, %cst_33 [2] : vector<1x8x8xf32> to vector<1x8xf32>
    %84 = vector.shape_cast %83 : vector<1x8xf32> to vector<1x8x1xf32>
    %85 = vector.broadcast %84 : vector<1x8x1xf32> to vector<1x8x8xf32>
    %86 = arith.subf %82, %85 : vector<1x8x8xf32>
    %87 = math.exp %86 : vector<1x8x8xf32>
    %cst_34 = arith.constant dense<0.000000e+00> : vector<1x8xf32>
    %88 = vector.multi_reduction <add>, %87, %cst_34 [2] : vector<1x8x8xf32> to vector<1x8xf32>
    %89 = vector.shape_cast %88 : vector<1x8xf32> to vector<1x8x1xf32>
    %90 = vector.broadcast %89 : vector<1x8x1xf32> to vector<1x8x8xf32>
    %91 = arith.divf %87, %90 : vector<1x8x8xf32>
    "tpu.trace_start"() <{level = 10 : i32, message = "bqk,bkd->bqd"}> : () -> ()
    %cst_35 = arith.constant dense<0.000000e+00> : vector<1x8x8xf32>
    %92 = tpu.matmul %91, %81, %cst_35 {dimension_numbers = #tpu.dot_dimension_numbers<[2], [1], [1], [2], [0, 0, 0, 1, 1, 2], [0], [0]>} : vector<1x8x8xf32>, vector<1x8x8xf32>, vector<1x8x8xf32> -> vector<1x8x8xf32>
    "tpu.trace_stop"() : () -> ()
    %93 = tpu.concatenate %50, %64, %78, %92 in 2 : vector<1x8x8xf32>, vector<1x8x8xf32>, vector<1x8x8xf32>, vector<1x8x8xf32> -> vector<1x8x32xf32>
    %94 = vector.shape_cast %93 : vector<1x8x32xf32> to vector<8x32xf32>
    %c0_36 = arith.constant 0 : index
    %c0_37 = arith.constant 0 : index
    %95 = vector.load %arg7[%c0_36, %c0_37] : memref<1x32xf32, #tpu.memory_space<vmem>>, vector<1x32xf32>
    %c0_38 = arith.constant 0 : index
    %c0_39 = arith.constant 0 : index
    %96 = vector.load %arg8[%c0_38, %c0_39] : memref<1x32xf32, #tpu.memory_space<vmem>>, vector<1x32xf32>
    %cst_40 = arith.constant dense<0.000000e+00> : vector<8xf32>
    %97 = vector.multi_reduction <add>, %94, %cst_40 [1] : vector<8x32xf32> to vector<8xf32>
    %98 = vector.shape_cast %97 : vector<8xf32> to vector<8x1xf32>
    %cst_41 = arith.constant 3.200000e+01 : f32
    %99 = vector.broadcast %cst_41 : f32 to vector<8x1xf32>
    %100 = arith.divf %98, %99 : vector<8x1xf32>
    %101 = arith.mulf %94, %94 : vector<8x32xf32>
    %cst_42 = arith.constant dense<0.000000e+00> : vector<8xf32>
    %102 = vector.multi_reduction <add>, %101, %cst_42 [1] : vector<8x32xf32> to vector<8xf32>
    %103 = vector.shape_cast %102 : vector<8xf32> to vector<8x1xf32>
    %cst_43 = arith.constant 3.200000e+01 : f32
    %104 = vector.broadcast %cst_43 : f32 to vector<8x1xf32>
    %105 = arith.divf %103, %104 : vector<8x1xf32>
    %106 = arith.mulf %100, %100 : vector<8x1xf32>
    %107 = arith.subf %105, %106 : vector<8x1xf32>
    %cst_44 = arith.constant 0.000000e+00 : f32
    %108 = vector.broadcast %cst_44 : f32 to vector<8x1xf32>
    %109 = arith.maximumf %107, %108 : vector<8x1xf32>
    %110 = vector.broadcast %100 : vector<8x1xf32> to vector<8x32xf32>
    %111 = arith.subf %94, %110 : vector<8x32xf32>
    %cst_45 = arith.constant 9.99999974E-6 : f32
    %112 = vector.broadcast %cst_45 : f32 to vector<8x1xf32>
    %113 = arith.addf %109, %112 : vector<8x1xf32>
    %114 = math.rsqrt %113 : vector<8x1xf32>
    %115 = vector.broadcast %114 : vector<8x1xf32> to vector<8x32xf32>
    %116 = arith.mulf %111, %115 : vector<8x32xf32>
    %117 = vector.broadcast %95 : vector<1x32xf32> to vector<8x32xf32>
    %118 = arith.mulf %116, %117 : vector<8x32xf32>
    %119 = vector.broadcast %96 : vector<1x32xf32> to vector<8x32xf32>
    %120 = arith.addf %118, %119 : vector<8x32xf32>
    %121 = arith.addf %27, %120 : vector<8x32xf32>
    %c0_46 = arith.constant 0 : index
    %c0_47 = arith.constant 0 : index
    %122 = vector.load %arg9[%c0_46, %c0_47] : memref<1x32xf32, #tpu.memory_space<vmem>>, vector<1x32xf32>
    %c0_48 = arith.constant 0 : index
    %c0_49 = arith.constant 0 : index
    %123 = vector.load %arg10[%c0_48, %c0_49] : memref<1x32xf32, #tpu.memory_space<vmem>>, vector<1x32xf32>
    %cst_50 = arith.constant dense<0.000000e+00> : vector<8xf32>
    %124 = vector.multi_reduction <add>, %121, %cst_50 [1] : vector<8x32xf32> to vector<8xf32>
    %125 = vector.shape_cast %124 : vector<8xf32> to vector<8x1xf32>
    %cst_51 = arith.constant 3.200000e+01 : f32
    %126 = vector.broadcast %cst_51 : f32 to vector<8x1xf32>
    %127 = arith.divf %125, %126 : vector<8x1xf32>
    %128 = arith.mulf %121, %121 : vector<8x32xf32>
    %cst_52 = arith.constant dense<0.000000e+00> : vector<8xf32>
    %129 = vector.multi_reduction <add>, %128, %cst_52 [1] : vector<8x32xf32> to vector<8xf32>
    %130 = vector.shape_cast %129 : vector<8xf32> to vector<8x1xf32>
    %cst_53 = arith.constant 3.200000e+01 : f32
    %131 = vector.broadcast %cst_53 : f32 to vector<8x1xf32>
    %132 = arith.divf %130, %131 : vector<8x1xf32>
    %133 = arith.mulf %127, %127 : vector<8x1xf32>
    %134 = arith.subf %132, %133 : vector<8x1xf32>
    %cst_54 = arith.constant 0.000000e+00 : f32
    %135 = vector.broadcast %cst_54 : f32 to vector<8x1xf32>
    %136 = arith.maximumf %134, %135 : vector<8x1xf32>
    %137 = vector.broadcast %127 : vector<8x1xf32> to vector<8x32xf32>
    %138 = arith.subf %121, %137 : vector<8x32xf32>
    %cst_55 = arith.constant 9.99999974E-6 : f32
    %139 = vector.broadcast %cst_55 : f32 to vector<8x1xf32>
    %140 = arith.addf %136, %139 : vector<8x1xf32>
    %141 = math.rsqrt %140 : vector<8x1xf32>
    %142 = vector.broadcast %141 : vector<8x1xf32> to vector<8x32xf32>
    %143 = arith.mulf %138, %142 : vector<8x32xf32>
    %144 = vector.broadcast %122 : vector<1x32xf32> to vector<8x32xf32>
    %145 = arith.mulf %143, %144 : vector<8x32xf32>
    %146 = vector.broadcast %123 : vector<1x32xf32> to vector<8x32xf32>
    %147 = arith.addf %145, %146 : vector<8x32xf32>
    %c0_56 = arith.constant 0 : index
    %c0_57 = arith.constant 0 : index
    %148 = vector.load %arg13[%c0_56, %c0_57] : memref<32x32xf32, #tpu.memory_space<vmem>>, vector<32x32xf32>
    %cst_58 = arith.constant dense<0.000000e+00> : vector<8x32xf32>
    %149 = tpu.matmul %147, %148, %cst_58 {dimension_numbers = #tpu.dot_dimension_numbers<[1], [0], [0], [1], [0, 0, 1, 1], [], []>} : vector<8x32xf32>, vector<32x32xf32>, vector<8x32xf32> -> vector<8x32xf32>
    %c0_59 = arith.constant 0 : index
    %c0_60 = arith.constant 0 : index
    %150 = vector.load %arg14[%c0_59, %c0_60] : memref<1x32xf32, #tpu.memory_space<vmem>>, vector<1x32xf32>
    %151 = vector.broadcast %150 : vector<1x32xf32> to vector<8x32xf32>
    %152 = arith.addf %149, %151 : vector<8x32xf32>
    %cst_61 = arith.constant 0.000000e+00 : f32
    %153 = vector.broadcast %cst_61 : f32 to vector<8x32xf32>
    %154 = arith.maximumf %152, %153 : vector<8x32xf32>
    %c0_62 = arith.constant 0 : index
    %c0_63 = arith.constant 0 : index
    %155 = vector.load %arg15[%c0_62, %c0_63] : memref<32x32xf32, #tpu.memory_space<vmem>>, vector<32x32xf32>
    %cst_64 = arith.constant dense<0.000000e+00> : vector<8x32xf32>
    %156 = tpu.matmul %154, %155, %cst_64 {dimension_numbers = #tpu.dot_dimension_numbers<[1], [0], [0], [1], [0, 0, 1, 1], [], []>} : vector<8x32xf32>, vector<32x32xf32>, vector<8x32xf32> -> vector<8x32xf32>
    %c0_65 = arith.constant 0 : index
    %c0_66 = arith.constant 0 : index
    %157 = vector.load %arg16[%c0_65, %c0_66] : memref<1x32xf32, #tpu.memory_space<vmem>>, vector<1x32xf32>
    %158 = vector.broadcast %157 : vector<1x32xf32> to vector<8x32xf32>
    %159 = arith.addf %156, %158 : vector<8x32xf32>
    %c0_67 = arith.constant 0 : index
    %c0_68 = arith.constant 0 : index
    %160 = vector.load %arg11[%c0_67, %c0_68] : memref<1x32xf32, #tpu.memory_space<vmem>>, vector<1x32xf32>
    %c0_69 = arith.constant 0 : index
    %c0_70 = arith.constant 0 : index
    %161 = vector.load %arg12[%c0_69, %c0_70] : memref<1x32xf32, #tpu.memory_space<vmem>>, vector<1x32xf32>
    %cst_71 = arith.constant dense<0.000000e+00> : vector<8xf32>
    %162 = vector.multi_reduction <add>, %159, %cst_71 [1] : vector<8x32xf32> to vector<8xf32>
    %163 = vector.shape_cast %162 : vector<8xf32> to vector<8x1xf32>
    %cst_72 = arith.constant 3.200000e+01 : f32
    %164 = vector.broadcast %cst_72 : f32 to vector<8x1xf32>
    %165 = arith.divf %163, %164 : vector<8x1xf32>
    %166 = arith.mulf %159, %159 : vector<8x32xf32>
    %cst_73 = arith.constant dense<0.000000e+00> : vector<8xf32>
    %167 = vector.multi_reduction <add>, %166, %cst_73 [1] : vector<8x32xf32> to vector<8xf32>
    %168 = vector.shape_cast %167 : vector<8xf32> to vector<8x1xf32>
    %cst_74 = arith.constant 3.200000e+01 : f32
    %169 = vector.broadcast %cst_74 : f32 to vector<8x1xf32>
    %170 = arith.divf %168, %169 : vector<8x1xf32>
    %171 = arith.mulf %165, %165 : vector<8x1xf32>
    %172 = arith.subf %170, %171 : vector<8x1xf32>
    %cst_75 = arith.constant 0.000000e+00 : f32
    %173 = vector.broadcast %cst_75 : f32 to vector<8x1xf32>
    %174 = arith.maximumf %172, %173 : vector<8x1xf32>
    %175 = vector.broadcast %165 : vector<8x1xf32> to vector<8x32xf32>
    %176 = arith.subf %159, %175 : vector<8x32xf32>
    %cst_76 = arith.constant 9.99999974E-6 : f32
    %177 = vector.broadcast %cst_76 : f32 to vector<8x1xf32>
    %178 = arith.addf %174, %177 : vector<8x1xf32>
    %179 = math.rsqrt %178 : vector<8x1xf32>
    %180 = vector.broadcast %179 : vector<8x1xf32> to vector<8x32xf32>
    %181 = arith.mulf %176, %180 : vector<8x32xf32>
    %182 = vector.broadcast %160 : vector<1x32xf32> to vector<8x32xf32>
    %183 = arith.mulf %181, %182 : vector<8x32xf32>
    %184 = vector.broadcast %161 : vector<1x32xf32> to vector<8x32xf32>
    %185 = arith.addf %183, %184 : vector<8x32xf32>
    %186 = arith.addf %147, %185 : vector<8x32xf32>
    %187 = vector.shape_cast %186 : vector<8x32xf32> to vector<1x8x32xf32>
    %c0_77 = arith.constant 0 : index
    %c0_78 = arith.constant 0 : index
    %c0_79 = arith.constant 0 : index
    %188 = vector.load %arg17[%c0_77, %c0_78, %c0_79] : memref<1x8x32xf32, #tpu.memory_space<vmem>>, vector<1x8x32xf32>
    tpu.vector_store %arg17[%c0_77, %c0_78, %c0_79], %187 {strides = array<i32>} : memref<1x8x32xf32, #tpu.memory_space<vmem>>, vector<1x8x32xf32>,
    return
  }
  func.func @transform_0(%arg0: i32) -> (i32, i32, i32) {
    %c0_i32 = arith.constant 0 : i32
    %c0_i32_0 = arith.constant 0 : i32
    %c0_i32_1 = arith.constant 0 : i32
    return %arg0, %c0_i32, %c0_i32_0 : i32, i32, i32
  }
  func.func @transform_1(%arg0: i32) -> (i32, i32) {
    %c0_i32 = arith.constant 0 : i32
    %c0_i32_0 = arith.constant 0 : i32
    %c0_i32_1 = arith.constant 0 : i32
    return %c0_i32, %c0_i32_0 : i32, i32
  }
  func.func @transform_2(%arg0: i32) -> (i32, i32) {
    %c0_i32 = arith.constant 0 : i32
    %c0_i32_0 = arith.constant 0 : i32
    %c0_i32_1 = arith.constant 0 : i32
    return %c0_i32, %c0_i32_0 : i32, i32
  }
  func.func @transform_3(%arg0: i32) -> (i32, i32) {
    %c0_i32 = arith.constant 0 : i32
    %c0_i32_0 = arith.constant 0 : i32
    %c0_i32_1 = arith.constant 0 : i32
    return %c0_i32, %c0_i32_0 : i32, i32
  }
  func.func @transform_4(%arg0: i32) -> (i32, i32) {
    %c0_i32 = arith.constant 0 : i32
    %c0_i32_0 = arith.constant 0 : i32
    %c0_i32_1 = arith.constant 0 : i32
    return %c0_i32, %c0_i32_0 : i32, i32
  }
  func.func @transform_5(%arg0: i32) -> (i32, i32) {
    %c0_i32 = arith.constant 0 : i32
    %c0_i32_0 = arith.constant 0 : i32
    %c0_i32_1 = arith.constant 0 : i32
    return %c0_i32, %c0_i32_0 : i32, i32
  }
  func.func @transform_6(%arg0: i32) -> (i32, i32) {
    %c0_i32 = arith.constant 0 : i32
    %c0_i32_0 = arith.constant 0 : i32
    %c0_i32_1 = arith.constant 0 : i32
    return %c0_i32, %c0_i32_0 : i32, i32
  }
  func.func @transform_7(%arg0: i32) -> (i32, i32) {
    %c0_i32 = arith.constant 0 : i32
    %c0_i32_0 = arith.constant 0 : i32
    %c0_i32_1 = arith.constant 0 : i32
    return %c0_i32, %c0_i32_0 : i32, i32
  }
  func.func @transform_8(%arg0: i32) -> (i32, i32) {
    %c0_i32 = arith.constant 0 : i32
    %c0_i32_0 = arith.constant 0 : i32
    %c0_i32_1 = arith.constant 0 : i32
    return %c0_i32, %c0_i32_0 : i32, i32
  }
  func.func @transform_9(%arg0: i32) -> (i32, i32) {
    %c0_i32 = arith.constant 0 : i32
    %c0_i32_0 = arith.constant 0 : i32
    %c0_i32_1 = arith.constant 0 : i32
    return %c0_i32, %c0_i32_0 : i32, i32
  }
  func.func @transform_10(%arg0: i32) -> (i32, i32) {
    %c0_i32 = arith.constant 0 : i32
    %c0_i32_0 = arith.constant 0 : i32
    %c0_i32_1 = arith.constant 0 : i32
    return %c0_i32, %c0_i32_0 : i32, i32
  }
  func.func @transform_11(%arg0: i32) -> (i32, i32) {
    %c0_i32 = arith.constant 0 : i32
    %c0_i32_0 = arith.constant 0 : i32
    %c0_i32_1 = arith.constant 0 : i32
    return %c0_i32, %c0_i32_0 : i32, i32
  }
  func.func @transform_12(%arg0: i32) -> (i32, i32) {
    %c0_i32 = arith.constant 0 : i32
    %c0_i32_0 = arith.constant 0 : i32
    %c0_i32_1 = arith.constant 0 : i32
    return %c0_i32, %c0_i32_0 : i32, i32
  }
  func.func @transform_13(%arg0: i32) -> (i32, i32) {
    %c0_i32 = arith.constant 0 : i32
    %c0_i32_0 = arith.constant 0 : i32
    %c0_i32_1 = arith.constant 0 : i32
    return %c0_i32, %c0_i32_0 : i32, i32
  }
  func.func @transform_14(%arg0: i32) -> (i32, i32) {
    %c0_i32 = arith.constant 0 : i32
    %c0_i32_0 = arith.constant 0 : i32
    %c0_i32_1 = arith.constant 0 : i32
    return %c0_i32, %c0_i32_0 : i32, i32
  }
  func.func @transform_15(%arg0: i32) -> (i32, i32) {
    %c0_i32 = arith.constant 0 : i32
    %c0_i32_0 = arith.constant 0 : i32
    %c0_i32_1 = arith.constant 0 : i32
    return %c0_i32, %c0_i32_0 : i32, i32
  }
  func.func @transform_16(%arg0: i32) -> (i32, i32, i32) {
    %c0_i32 = arith.constant 0 : i32
    %c0_i32_0 = arith.constant 0 : i32
    %c0_i32_1 = arith.constant 0 : i32
    return %arg0, %c0_i32, %c0_i32_0 : i32, i32, i32
  }
}

</mosaic_0001>

<bundles_post_ra>
// kernel: tpu_custom_call.1
= control target key start
LH: loop header
LB: loop body
LE: loop exit
PB: predicated region body
PF: predicated region fallthrough
CT: control target
= control target key end

     0   :  { %s2965_s0 = inlined_call_operand.hbm [shape: f32[2,8,32], index: 0, kind: input, shape index: {}]   ;;  %s2966_s1 = inlined_call_operand.hbm [shape: f32[32,32], index: 1, kind: input, shape index: {}]   ;;  %s2967_s2 = inlined_call_operand.hbm [shape: f32[32,32], index: 2, kind: input, shape index: {}]   ;;  %s2968_s3 = inlined_call_operand.hbm [shape: f32[32,32], index: 3, kind: input, shape index: {}]   ;;  %s2969_s4 = inlined_call_operand.vmem [shape: f32[1,32], index: 4, kind: input, shape index: {}]   ;;  %s2970_s5 = inlined_call_operand.vmem [shape: f32[1,32], index: 5, kind: input, shape index: {}]   ;;  %s2971_s6 = inlined_call_operand.vmem [shape: f32[1,32], index: 6, kind: input, shape index: {}]   ;;  %s2972_s7 = inlined_call_operand.vmem [shape: f32[1,32], index: 7, kind: input, shape index: {}]   ;;  %s2973_s8 = inlined_call_operand.vmem [shape: f32[1,32], index: 8, kind: input, shape index: {}]   ;;  %s2974_s9 = inlined_call_operand.vmem [shape: f32[1,32], index: 9, kind: input, shape index: {}]   ;;  %s2975_s10 = inlined_call_operand.vmem [shape: f32[1,32], index: 10, kind: input, shape index: {}]   ;;  %s2976_s11 = inlined_call_operand.vmem [shape: f32[1,32], index: 11, kind: input, shape index: {}]   ;;  %s2977_s12 = inlined_call_operand.hbm [shape: f32[32,32], index: 12, kind: input, shape index: {}]   ;;  %s2978_s13 = inlined_call_operand.vmem [shape: f32[1,32], index: 13, kind: input, shape index: {}]   ;;  %s2979_s14 = inlined_call_operand.hbm [shape: f32[32,32], index: 14, kind: input, shape index: {}]   ;;  %s2980_s15 = inlined_call_operand.vmem [shape: f32[1,32], index: 15, kind: input, shape index: {}]   ;;  %s2981_s16 = inlined_call_operand.hbm [shape: f32[2,8,32], index: 16, kind: output, shape index: {}]  }
   0x1   :  { %2992 = sst [smem:[#allocation23_spill]] %s2965_s0 }
   0x2   :  { %2993 = sst [smem:[#allocation24_spill]] %s2966_s1 }
   0x3   :  { %2994 = sst [smem:[#allocation25_spill]] %s2967_s2 }
   0x4   :  { %2995 = sst [smem:[#allocation26_spill]] %s2968_s3 }
   0x5   :  { %2996 = sst [smem:[#allocation27_spill]] %s2976_s11 }
   0x6   :  { %2997 = sst [smem:[#allocation28_spill]] %s2977_s12 }
   0x7   :  { %2998 = sst [smem:[#allocation29_spill]] %s2979_s14 }
   0x8   :  { %2999 = sst [smem:[#allocation30_spill]] %s2981_s16 }
   0x9   :  { %21 = vsyncpa [#allocation3], 0 }
   0xa   :  { %23 = vsyncpa [#allocation3 + $0x1], 0 }
   0xb   :  { %24 = vsyncpa [#allocation6], 0 }
   0xc   :  { %25 = vsyncpa [#allocation9], 0 }
   0xd   :  { %26 = vsyncpa [#allocation12], 0 }
   0xe   :  { %27 = vsyncpa [#allocation4], 0 }
   0xf   :  { %29 = vsyncpa [#allocation4 + $0x1], 0  ;;  %s2598_s21 = smov 0   ;;  %s2600_s22 = smov 0  }
  0x10   :  { %s2602_s23 = smov 0   ;;  %s2604_s24 = smov 0  }
  0x11 LB: > { %3000 = sst [smem:[#allocation19_spill]] %s2490_s23  ;;  %s2496_s25 = smov [#allocation5]   ;;  %s2494_s24 = sphi %s2604_s24, %s3031_s24   ;;  %s2490_s23 = sphi %s2602_s23, %s3033_s23   ;;  %s2486_s22 = sphi %s2600_s22, %s3035_s22   ;;  %s2482_s21 = sphi %s2598_s21, %s3034_s21  }
  0x12   : > { %3001 = sst [smem:[#allocation20_spill]] %s2494_s24  ;;  %s419_s26 = sshll.u32 %s2496_s25, 4  ;;  %s420_s26 = int_to_ptr.vmem [resolvable:$true] %s419_s26 }
  0x13   : > { %s2619_s27 = sadd.s32 4294967295, %s2494_s24   ;;  %p1945_p0 = scmp.ge.s32.totalorder %s2494_s24, 1 }
  0x14   : > { %p2985_p1 = scmp.eq.s32.totalorder %s2619_s27, 0  ;;  %p407_p2 = scmp.lt.s32.totalorder %s2494_s24, 3 }
  0x15   : > { %s2497_s29 = smov [#allocation8]   ;;  %s2498_s17 = smov [#allocation7]  }
  0x16   : > { %p2624_p3 = pnand %p1945_p0, %p407_p2  ;;  %s445_s30 = sshll.u32 %s2497_s29, 4  ;;  %s2637_s30 = int_to_ptr.vmem [resolvable:$true] %s445_s30 }
  0x17   : > { %s432_s18 = sshll.u32 %s2498_s17, 4  ;;  %s2271_s20 = scalar_lea.vmem %s420_s26, 512  ;;  %s2639_s18 = int_to_ptr.vmem [resolvable:$true] %s432_s18 }
  0x18   : > { %s3002_s28 = scalar_select %p2624_p3, 1, 0 }
  0x19   : > { %p2153_p5 = pneg %p2624_p3  ;;  %p2272_p8 = scmp.ne.s32.totalorder %s420_s26, %s2271_s20 }
  0x1a   : > { %p2279_p11 = scmp.lt.s32.totalorder %s420_s26, %s420_s26  ;;  %p2280_p12 = scmp.lt.s32.totalorder %s2271_s20, %s2271_s20 }
  0x1b   : > { %p2633_p6 = pnand %p2153_p5, %p2985_p1 }
  0x1c   : > { %p2281_p13 = por %p2280_p12, %p2279_p11 }
  0x1d   : > { %p2643_p7 = pneg %p2633_p6 }
  0x1f   : > { %p2274_p9 = pnand %p2272_p8, %p2643_p7 }
  0x21   : > { %p2275_p10 = pneg %p2274_p9 }
  0x23   : > { %p2282_p0 = pnand %p2281_p13, %p2275_p10 }
  0x25   : > { %2285 = shalt.err (!%p2282_p0)
}
  0x26   : > { %s2499_s25 = smov 128   ;;  %s2500_s29 = smov 8  }
  0x27   : > { %s3005_s1 = sld [smem:[#allocation24_spill]]  ;;  %s2297_s11 = scalar_lea.vmem %s2637_s30, 512 }
  0x28   : > { %p2298_p2 = scmp.ne.s32.totalorder %s2637_s30, %s2297_s11  ;;  %p2305_p9 = scmp.lt.s32.totalorder %s2637_s30, %s2637_s30 }
  0x29   : > { %p2306_p10 = scmp.lt.s32.totalorder %s2297_s11, %s2297_s11 }
  0x2a   : > { %p2300_p5 = pnand %p2298_p2, %p2643_p7 }
  0x2b   : > { %p2307_p11 = por %p2306_p10, %p2305_p9 }
  0x2c   : > { %p2301_p8 = pneg %p2300_p5 }
  0x2d   : > { %2156 = dma.hbm_to_vmem [thread:$0]  (!%p2633_p6), %s3005_s1, 512, %s420_s26, [#allocation6], %s2499_s25, %s2499_s25, %s2500_s29  }
  0x2e   : > { %p2308_p12 = pnand %p2307_p11, %p2301_p8 }
  0x30   : > { %2311 = shalt.err (!%p2308_p12)
}
  0x31   : > { %s3006_s3 = sld [smem:[#allocation26_spill]]  ;;  %s2323_s26 = scalar_lea.vmem %s2639_s18, 512 }
  0x32   : > { %p2324_p13 = scmp.ne.s32.totalorder %s2639_s18, %s2323_s26  ;;  %p2331_p5 = scmp.lt.s32.totalorder %s2639_s18, %s2639_s18 }
  0x33   : > { %p2332_p8 = scmp.lt.s32.totalorder %s2323_s26, %s2323_s26 }
  0x34   : > { %p2326_p0 = pnand %p2324_p13, %p2643_p7 }
  0x35   : > { %p2333_p9 = por %p2332_p8, %p2331_p5 }
  0x36   : > { %p2327_p2 = pneg %p2326_p0 }
  0x37   : > { %2162 = dma.hbm_to_vmem [thread:$0]  (!%p2633_p6), %s3006_s3, 512, %s2637_s30, [#allocation9], %s2499_s25, %s2499_s25, %s2500_s29  }
  0x38   : > { %p2334_p10 = pnand %p2333_p9, %p2327_p2 }
  0x3a   : > { %2337 = shalt.err (!%p2334_p10)
}
  0x3b   : > { %s3007_s2 = sld [smem:[#allocation25_spill]]  ;;  %s2501_s30 = smov [#allocation10]  }
  0x3c   : > { %s482_s20 = sshll.u32 %s2501_s30, 4  ;;  %s2502_s16 = smov [#allocation11]   ;;  %s483_s20 = int_to_ptr.vmem [resolvable:$true] %s482_s20 }
  0x3d   : > { %s498_s1 = sshll.u32 %s2502_s16, 4  ;;  %s2349_s26 = scalar_lea.vmem %s483_s20, 512  ;;  %s499_s1 = int_to_ptr.vmem [resolvable:$true] %s498_s1 }
  0x3e   : > { %p2350_p11 = scmp.ne.s32.totalorder %s483_s20, %s2349_s26  ;;  %p2357_p0 = scmp.lt.s32.totalorder %s483_s20, %s483_s20 }
  0x3f   : > { %p2358_p2 = scmp.lt.s32.totalorder %s2349_s26, %s2349_s26 }
  0x40   : > { %p2352_p12 = pnand %p2350_p11, %p2643_p7 }
  0x41   : > { %2159 = dma.hbm_to_vmem [thread:$0]  (!%p2633_p6), %s3007_s2, 512, %s2639_s18, [#allocation6], %s2499_s25, %s2499_s25, %s2500_s29  }
  0x42   : > { %p2353_p13 = pneg %p2352_p12  ;;  %p2359_p5 = por %p2358_p2, %p2357_p0 }
  0x44   : > { %p2360_p8 = pnand %p2359_p5, %p2353_p13 }
  0x46   : > { %2363 = shalt.err (!%p2360_p8)
}
  0x47   : > { %s3008_s12 = sld [smem:[#allocation28_spill]]  ;;  %s2375_s17 = scalar_lea.vmem %s499_s1, 512 }
  0x48   : > { %p2376_p9 = scmp.ne.s32.totalorder %s499_s1, %s2375_s17  ;;  %p2383_p12 = scmp.lt.s32.totalorder %s499_s1, %s499_s1 }
  0x49   : > { %p2384_p0 = scmp.lt.s32.totalorder %s2375_s17, %s2375_s17 }
  0x4a   : > { %p2378_p10 = pnand %p2376_p9, %p2643_p7 }
  0x4b   : > { %p2385_p13 = por %p2384_p0, %p2383_p12 }
  0x4c   : > { %p2379_p11 = pneg %p2378_p10 }
  0x4d   : > { %2165 = dma.hbm_to_vmem [thread:$0]  (!%p2633_p6), %s3008_s12, 512, %s483_s20, [#allocation9], %s2499_s25, %s2499_s25, %s2500_s29  }
  0x4e   : > { %p2386_p2 = pnand %p2385_p13, %p2379_p11 }
  0x50   : > { %2389 = shalt.err (!%p2386_p2)
}
  0x51   : > { %s3009_s14 = sld [smem:[#allocation29_spill]]  ;;  %s1944_s0 = sadd.s32 4294967294, %s2494_s24  }
  0x52   : > { %s2709_s19 = sadd.s32 1, %s2494_s24   ;;  %s42_s20 = sadd.s32 1, %s2490_s23 }
  0x53   : > { %3010 = sst [smem:[#allocation21_spill]] %s2709_s19  ;;  %s39_s26 = ssub.s32 %s2494_s24, %s2709_s19 }
  0x54   : > { %p49_p7 = scmp.ne.s32.totalorder %s2490_s23, %s2486_s22  ;;  %p40_p5 = scmp.eq.s32.totalorder %s39_s26, 0 }
  0x55   : > { %p50_p8 = scmp.eq.s32.totalorder %s2494_s24, 0  ;;  %p55_p9 = scmp.ne.s32.totalorder %s2486_s22, %s2482_s21 }
  0x56   : > { %p394_p10 = scmp.eq.s32.totalorder %s2619_s27, 1  ;;  %p400_p0 = scmp.eq.s32.totalorder %s1944_s0, 1 }
  0x57   : > { %2168 = dma.hbm_to_vmem [thread:$0]  (!%p2633_p6), %s3009_s14, 512, %s499_s1, [#allocation12], %s2499_s25, %s2499_s25, %s2500_s29  }
  0x58   : > { %s2721_s18 = scalar_select %p40_p5, %s2490_s23, %s42_s20  }
  0x59   : > { %p51_p11 = por %p50_p8, %p49_p7  ;;  %p2725_p12 = por %p2985_p1, %p55_p9 }
  0x5a   : > { %3011 = sst [smem:[#allocation22_spill]] %s2721_s18  ;;  %p2729_p6 = por %p394_p10, %p49_p7 }
  0x5b   : > { %s3012_s11 = scalar_select %p2725_p12, 1, 0 }
  0x5c   : > { %s3013_s1 = scalar_select %p2729_p6, 1, 0 }
  0x5d   : > { %p2182_p13 = scmp.lt.s32.totalorder %s2494_s24, 2  ;;  %s515_s25 = sand.u32 1, %s2490_s23  }
  0x5e   : > { %p2735_p2 = por %p400_p0, %p55_p9  ;;  %s1952_s17 = sshll.u32 %s515_s25, 3 }
  0x5f   : > { %s1953_s30 = sshll.u32 %s2494_s24, 7  ;;  %s3015_s26 = sld [smem:[#allocation23_spill]] }
  0x60   : > { %s3014_s29 = scalar_select %p2735_p2, 1, 0 }
  0x61   : > { %s519_s3 = scalar_lea.vmem [#allocation2], %s1952_s17  ;;  %p2745_p7 = pnand %p2182_p13, %p51_p11 }
  0x62   : > { %s526_s12 = sshll.u32 %s519_s3, 4  ;;  %s516_s14 = scalar_lea.sflag [#allocation3], %s515_s25  ;;  %s527_s12 = int_to_ptr.vmem [resolvable:$true] %s526_s12 }
  0x63   : > { %p2392_p8 = pneg %p2745_p7 }
  0x65   : > { %s2743_s2 = scalar_lea.hbm %s3015_s26, %s1953_s30  ;;  %s2395_s20 = scalar_lea.hbm %s3015_s26, 256 }
  0x66   : > { %s2390_s18 = scalar_lea.hbm %s2743_s2, 128  ;;  %p2396_p11 = scmp.lt.s32.totalorder %s2743_s2, %s3015_s26 }
  0x67   : > { %p2391_p5 = scmp.ne.s32.totalorder %s2743_s2, %s2390_s18  ;;  %p2397_p0 = scmp.lt.s32.totalorder %s2395_s20, %s2390_s18 }
  0x69   : > { %p2393_p9 = pnand %p2392_p8, %p2391_p5  ;;  %p2398_p13 = por %p2397_p0, %p2396_p11 }
  0x6b   : > { %p2394_p10 = pneg %p2393_p9 }
  0x6d   : > { %p2399_p4 = pnand %p2398_p13, %p2394_p10 }
  0x6f   : > { %2402 = shalt.err (!%p2399_p4)
}
  0x70   : > { %s2403_s3 = scalar_lea.vmem %s527_s12, 128  ;;  %s2503_s25 = smov [#allocation2]  }
  0x71   : > { %p2404_p1 = scmp.ne.s32.totalorder %s527_s12, %s2403_s3  ;;  %s2408_s19 = sshll.u32 %s2503_s25, 4  ;;  %s2409_s19 = int_to_ptr.vmem [resolvable:$false] %s2408_s19 }
  0x72   : > { %s2410_s24 = scalar_lea.vmem %s2409_s19, 256  ;;  %p2411_p5 = scmp.lt.s32.totalorder %s527_s12, %s2409_s19 }
  0x73   : > { %p2406_p2 = pnand %p2404_p1, %p2392_p8  ;;  %p2412_p9 = scmp.lt.s32.totalorder %s2410_s24, %s2403_s3 }
  0x75   : > { %p2407_p6 = pneg %p2406_p2  ;;  %p2413_p12 = por %p2412_p9, %p2411_p5 }
  0x77   : > { %p2414_p3 = pnand %p2413_p12, %p2407_p6 }
  0x79   : > { %2417 = shalt.err (!%p2414_p3)
}
  0x7a   : > { %2172 = dma.hbm_to_vmem [thread:$0]  (!%p2745_p7), %s2743_s2, 128, %s527_s12, %s516_s14  }
  0x7b   : > { %p3017_p10 = scmp.ne.s32.totalorder %s3002_s28, 0 }
  0x7c   : > { %s2766_s23 = sand.u32 (!%p3017_p10), 1, %s2486_s22   ;;  %p3018_p1 = scmp.ne.s32.totalorder (!%p3017_p10), %s3012_s11, 0 }
  0x7d   : > { %535 = sbr.rel (%p3017_p10) target bundleno = 2407 (0x967), region = 84  ;;  %s1955_s18 = sshll.u32 (!%p3017_p10), %s2766_s23, 3 }
  0x7e   : > { %s538_s19 = scalar_lea.sflag (!%p3017_p10), [#allocation3], %s2766_s23  ;;  %s541_s24 = scalar_lea.vmem (!%p3017_p10), [#allocation2], %s1955_s18 }
  0x82   : > { %2461 = dma.done.wait (%p3018_p1), %s538_s19, 128  }
  0x83   : > { %2463 = vsyncadd (%p3018_p1), %s538_s19, 4294967168  ;;  %p3019_p3 = scmp.eq.s32.totalorder %s2619_s27, 0 }
  0x85   : > { %2465 = dma.done.wait (%p3019_p3), [#allocation6], 1024   ;;  %p3020_p4 = pmov %p3019_p3 }
  0x86   : > { %p3021_p12 = pmov %p3019_p3 }
  0x87   : > { %2467 = vsyncadd (%p3020_p4), [#allocation6], 4294966272 }
  0x88   : > { %2469 = dma.done.wait (%p3021_p12), [#allocation9], 1024   ;;  %p3022_p6 = pmov %p3019_p3 }
  0x89   : > { %p3023_p2 = pmov %p3019_p3 }
  0x8a   : > { %2471 = vsyncadd (%p3022_p6), [#allocation9], 4294966272 }
  0x8b   : > { %2473 = dma.done.wait (%p3023_p2), [#allocation12], 512   ;;  %p3024_p7 = pmov %p3023_p2 }
  0x8c   : > { %vm613_vm0 = vcmask 261120   ;;  %v610_v0 = vld [vmem:[%s541_s24] sm:$0xff]  ;;  %v2504_v6 = vmov 0.0   ;;  %v646_v9 = vld [vmem:[#allocation5 + $0x8] sm:$0xff]  ;;  %v645_v11 = vld [vmem:[#allocation5] sm:$0xff]  ;;  %vm2505_vm1 = vmmov 0  }
  0x8d   : > { %2475 = vsyncadd (%p3024_p7), [#allocation12], 4294966784  ;;  %v614_v1 = vsel %vm613_vm0, %v610_v0, 0.0  ;;  %v619_v2 = vmul.f32 %v610_v0, %v610_v0  ;;  %v648_v4 = vld [vmem:[#allocation5 + $0x18] sm:$0xff]  ;;  %2034 = vmatprep.subr.mxu0 %v2504_v6  ;;  %2045 = vmatprep.subr.mxu1 %v2504_v6  ;;  %v647_v7 = vld [vmem:[#allocation5 + $0x10] sm:$0xff]  ;;  %vm870_vm2 = vcmask 64512  }
  0x8e   : > { %615 = vadd.xlane.f32.xlu0 %v614_v1  ;;  %v725_v5 = vld [vmem:[#allocation7 + $0x18] sm:$0xff]  ;;  %v724_v8 = vld [vmem:[#allocation7 + $0x10] sm:$0xff]  ;;  %2035 = vmatpush3.msra.mxu0 %v648_v4  ;;  %v723_v10 = vld [vmem:[#allocation7 + $0x8] sm:$0xff]  ;;  %s2506_s11 = smov 112   ;;  %s2507_s0 = smov 120   ;;  %vm1540_vm3 = vcmask 130048  }
  0x8f   : > { %v620_v3 = vsel %vm613_vm0, %v619_v2, 0.0  ;;  %2046 = vmatpush3.msra.mxu1 %v725_v5  ;;  %2036 = vmatprep.subr.mxu0 %v2504_v6  ;;  %v722_v12 = vld [vmem:[#allocation7] sm:$0xff]  ;;  %v1962_v23 = vld [vmem:[%s2969_s4] ss:$0 sm:$0xff]  ;;  %v799_v28 = vld [vmem:[#allocation8 + $0x18] sm:$0xff]  ;;  %s2508_s30 = smov 104  }
  0x90   : > { %2047 = vmatprep.subr.mxu1 %v2504_v6  ;;  %2037 = vmatpush3.msra.mxu0 %v647_v7  ;;  %v1963_v25 = vld [vmem:[%s2970_s5] ss:$0 sm:$0xff]  ;;  %v797_v30 = vld [vmem:[#allocation8 + $0x8] sm:$0xff]  ;;  %v796_v31 = vld [vmem:[#allocation8] sm:$0xff]  ;;  %s2509_s16 = smov 8   ;;  %s2510_s20 = smov 16  }
  0x91   : > { %2048 = vmatpush3.msra.mxu1 %v724_v8  ;;  %2038 = vmatprep.subr.mxu0 %v2504_v6  ;;  %v798_v29 = vld [vmem:[#allocation8 + $0x10] sm:$0xff]  ;;  %s2511_s17 = smov 24   ;;  %vm1542_vm4 = vcmask 195584   ;;  %s3025_s19 = sld [smem:[#allocation27_spill]] }
  0x92   : > { %621 = vadd.xlane.f32.xlu0 %v620_v3  ;;  %2049 = vmatprep.subr.mxu1 %v2504_v6  ;;  %s1990_s24 = sshll.u32 %s2619_s27, 7  ;;  %s609_s2 = scalar_lea.vmem [#allocation13], %s1955_s18 }
  0x93   : > { %2039 = vmatpush3.msra.mxu0 %v646_v9  ;;  %2050 = vmatpush3.msra.mxu1 %v723_v10  ;;  %s1826_s12 = sshll.u32 %s609_s2, 4  ;;  %p3027_p11 = scmp.ne.s32.totalorder %s3013_s1, 0  ;;  %s1827_s12 = int_to_ptr.vmem [resolvable:$true] %s1826_s12 }
  0x94   : > { %2040 = vmatprep.subr.mxu0 %v2504_v6  ;;  %2051 = vmatprep.subr.mxu1 %v2504_v6 }
  0x95   : > { %2041 = vmatpush3.msra.mxu0 %v645_v11  ;;  %2042 = vmatprep.mubr.msk.f32.mxu0 %vm2505_vm1, %v2504_v6 }
  0x96   : > { %2052 = vmatpush3.msra.mxu1 %v722_v12  ;;  %2053 = vmatprep.mubr.msk.f32.mxu1 %vm2505_vm1, %v2504_v6 }
  0x97   : > { %2056 = vmatprep.subr.mxu0 %v2504_v6  ;;  %2067 = vmatprep.subr.mxu1 %v2504_v6 }
 0x117   : > { %v616_v13 = vpop.xlane.xlu0 %615 }
 0x118   : > { %v618_v14 = vmul.f32 0.03125, %v616_v13 }
 0x11a   : > { %v624_v16 = vmul.f32 %v618_v14, %v618_v14  ;;  %v627_v21 = vsub.f32 %v610_v0, %v618_v14 }
 0x11b   : > { %v622_v15 = vpop.xlane.xlu0 %621 }
 0x11c   : > { %v623_v17 = vmul.f32 0.03125, %v622_v15 }
 0x11e   : > { %v625_v18 = vsub.f32 %v623_v17, %v624_v16 }
 0x120   : > { %v626_v19 = vmax.f32 %v625_v18, 0.0 }
 0x122   : > { %v628_v20 = vadd.f32 1e-05, %v626_v19 }
 0x124   : > { %2236 = vrsqrt.f32 %v628_v20 }
 0x131   : > { %v2237_v22 = vpop.eup %2236 }
 0x132   : > { %v630_v24 = vmul.f32 %v2237_v22, %v627_v21 }
 0x134   : > { %v637_v26 = vmul.f32 %v1962_v23, %v630_v24 }
 0x136   : > { %v2810_v27 = vadd.f32 %v1963_v25, %v637_v26 }
 0x138   : > { %2043 = vmatmul.mubr.msk.f32.vlgmr.msra.gmra.mxu0 %vm613_vm0, %v2810_v27  ;;  %2054 = vmatmul.mubr.msk.f32.vlgmr.msra.gmra.mxu1 %vm613_vm0, %v2810_v27 }
 0x139   : > { %2057 = vmatpush3.msra.mxu0 %v799_v28  ;;  %2064 = vmatprep.mubr.msk.f32.mxu0 %vm2505_vm1, %v2504_v6 }
 0x13a   : > { %2058 = vmatprep.subr.mxu0 %v2504_v6  ;;  %2069 = vmatprep.mubr.msk.f32.mxu1 %vm2505_vm1, %v2504_v6 }
 0x13b   : > { %2059 = vmatpush3.msra.mxu0 %v798_v29 }
 0x13c   : > { %2060 = vmatprep.subr.mxu0 %v2504_v6 }
 0x13d   : > { %2061 = vmatpush3.msra.mxu0 %v797_v30 }
 0x13e   : > { %2062 = vmatprep.subr.mxu0 %v2504_v6 }
 0x13f   : > { %2063 = vmatpush3.msra.mxu0 %v796_v31 }
 0x140   : > { %2065 = vmatmul.mubr.msk.f32.vlgmr.msra.gmra.mxu0 %vm613_vm0, %v2810_v27  ;;  %2077 = vmatprep.subr.mxu0 %v2504_v6 }
 0x141   : > { %2079 = vmatprep.mubr.msk.f32.mxu0 %vm2505_vm1, %v2504_v6 }
 0x1f8   : > { %v718_v32 = vpop.f32.mrf.mxu0  ;;  %v792_v33 = vpop.f32.mrf.mxu1 }
 0x1f9   : > { %1199 = vrot.lane.b32.xlu0 %v792_v33, %s2506_s11  ;;  %1033 = vrot.lane.b32.xlu1 %v792_v33, %s2507_s0 }
 0x1fa   : > { %2068 = vmatpush3.xpose.msk.msra.mxu1 %vm870_vm2, %v792_v33  ;;  %v2044_v34 = vpop.f32.mrf.mxu0  ;;  %v2055_v35 = vpop.f32.mrf.mxu1 }
 0x1fb   : > { %2072 = vmatprep.subr.mxu1 %v2504_v6 }
 0x1fd   : > { %2070 = vmatmul.mubr.msk.f32.vlgmr.msra.gmra.mxu1 %vm870_vm2, %v718_v32  ;;  %1031 = vrot.lane.b32.xlu1 %v718_v32, %s2507_s0 }
 0x1fe   : > { %2074 = vmatprep.mubr.msk.f32.mxu1 %vm2505_vm1, %v2504_v6 }
 0x200   : > { %v2836_v36 = vpop.f32.mrf.mxu0 }
 0x201   : > { %2073 = vmatpush3.msra.mxu1 %v2836_v36  ;;  %1197 = vrot.lane.b32.xlu1 %v718_v32, %s2506_s11 }
 0x202   : > { %v2066_v37 = vpop.f32.mrf.mxu0  ;;  %2082 = vmatprep.subr.mxu1 %v2504_v6 }
 0x205   : > { %1364 = vrot.lane.b32.xlu1 %v792_v33, %s2508_s30 }
 0x209   : > { %1362 = vrot.lane.b32.xlu1 %v718_v32, %s2508_s30 }
 0x26b   : > { %v1034_v38 = vpop.permute.xlu1 %1033  ;;  %v1200_v40 = vpop.permute.xlu0 %1199 }
 0x26c   : > { %2078 = vmatpush3.xpose.msk.msra.mxu0 %vm870_vm2, %v1034_v38 }
 0x26d   : > { %2087 = vmatprep.subr.mxu0 %v2504_v6 }
 0x26f   : > { %v1032_v39 = vpop.permute.xlu1 %1031 }
 0x270   : > { %2080 = vmatmul.mubr.msk.f32.vlgmr.msra.gmra.mxu0 %vm870_vm2, %v1032_v39 }
 0x271   : > { %2088 = vmatpush3.xpose.msk.msra.mxu0 %vm870_vm2, %v1200_v40  ;;  %2089 = vmatprep.mubr.msk.f32.mxu0 %vm2505_vm1, %v2504_v6 }
 0x272   : > { %2097 = vmatprep.subr.mxu0 %v2504_v6 }
 0x273   : > { %v1198_v41 = vpop.permute.xlu1 %1197 }
 0x274   : > { %2090 = vmatmul.mubr.msk.f32.vlgmr.msra.gmra.mxu0 %vm870_vm2, %v1198_v41 }
 0x275   : > { %2099 = vmatprep.mubr.msk.f32.mxu0 %vm2505_vm1, %v2504_v6 }
 0x277   : > { %v1365_v42 = vpop.permute.xlu1 %1364 }
 0x278   : > { %2098 = vmatpush3.xpose.msk.msra.mxu0 %vm870_vm2, %v1365_v42 }
 0x279   : > { %2107 = vmatprep.subr.mxu0 %v2504_v6 }
 0x27b   : > { %v1363_v43 = vpop.permute.xlu1 %1362 }
 0x27c   : > { %2100 = vmatmul.mubr.msk.f32.vlgmr.msra.gmra.mxu0 %vm870_vm2, %v1363_v43 }
 0x27d   : > { %2115 = vmatprep.mubr.msk.f32.mxu0 %vm2505_vm1, %v2504_v6 }
 0x2bd   : > { %v943_v44 = vpop.f32.mrf.mxu1 }
 0x2be   : > { %v947_v45 = vsel %vm870_vm2, %v943_v44, -inf }
 0x2bf   : > { %948 = vmax.xlane.f32.xlu1 %v947_v45  ;;  %v2071_v46 = vpop.f32.mrf.mxu1 }
 0x330   : > { %v1105_v47 = vpop.f32.mrf.mxu0 }
 0x331   : > { %v1109_v48 = vsel %vm870_vm2, %v1105_v47, -inf }
 0x332   : > { %1110 = vmax.xlane.f32.xlu0 %v1109_v48  ;;  %v2081_v49 = vpop.f32.mrf.mxu0 }
 0x334   : > { %v1271_v50 = vpop.f32.mrf.mxu0 }
 0x335   : > { %v1275_v51 = vsel %vm870_vm2, %v1271_v50, -inf }
 0x336   : > { %1276 = vmax.xlane.f32.xlu1 %v1275_v51  ;;  %v2091_v52 = vpop.f32.mrf.mxu0 }
 0x33c   : > { %v1436_v53 = vpop.f32.mrf.mxu0 }
 0x33d   : > { %v1440_v54 = vsel %vm870_vm2, %v1436_v53, -inf }
 0x33e   : > { %1441 = vmax.xlane.f32.xlu1 %v1440_v54  ;;  %v2101_v55 = vpop.f32.mrf.mxu0 }
 0x348   : > { %v949_v56 = vpop.xlane.xlu1 %948 }
 0x349   : > { %v950_v57 = vsub.f32 %v943_v44, %v949_v56  ;;  %v1979_v56 = vld [vmem:[%s2971_s6] ss:$0 sm:$0xff] }
 0x34b   : > { %v951_v58 = vmul.f32 1.442695, %v950_v57 }
 0x34d   : > { %2238 = vpow2.f32 %v951_v58  ;;  %v1980_v58 = vld [vmem:[%s2972_s7] ss:$0 sm:$0xff] }
 0x35a   : > { %v2239_v59 = vpop.eup %2238 }
 0x35b   : > { %v953_v60 = vsel %vm870_vm2, %v2239_v59, 0.0 }
 0x35c   : > { %954 = vadd.xlane.f32.xlu0 %v953_v60 }
 0x3bb   : > { %v1111_v61 = vpop.xlane.xlu0 %1110 }
 0x3bc   : > { %v1112_v62 = vsub.f32 %v1105_v47, %v1111_v61 }
 0x3be   : > { %v1113_v63 = vmul.f32 1.442695, %v1112_v62 }
 0x3bf   : > { %v1277_v0 = vpop.xlane.xlu1 %1276 }
 0x3c0   : > { %2240 = vpow2.f32 %v1113_v63  ;;  %v1278_v1 = vsub.f32 %v1271_v50, %v1277_v0 }
 0x3c2   : > { %v1279_v2 = vmul.f32 1.442695, %v1278_v1  ;;  %v1612_v1 = vld [vmem:[#allocation10 + $0x18] sm:$0xff] }
 0x3c3   : > { %2108 = vmatpush3.msra.mxu0 %v1612_v1 }
 0x3c4   : > { %2242 = vpow2.f32 %v1279_v2  ;;  %v1611_v2 = vld [vmem:[#allocation10 + $0x10] sm:$0xff]  ;;  %2109 = vmatprep.subr.mxu0 %v2504_v6 }
 0x3c5   : > { %2110 = vmatpush3.msra.mxu0 %v1611_v2 }
 0x3c6   : > { %2111 = vmatprep.subr.mxu0 %v2504_v6 }
 0x3c7   : > { %v1442_v9 = vpop.xlane.xlu1 %1441 }
 0x3c8   : > { %v1443_v10 = vsub.f32 %v1436_v53, %v1442_v9 }
 0x3ca   : > { %v1444_v11 = vmul.f32 1.442695, %v1443_v10 }
 0x3cd   : > { %v2241_v3 = vpop.eup %2240 }
 0x3ce   : > { %v1115_v4 = vsel %vm870_vm2, %v2241_v3, 0.0 }
 0x3cf   : > { %1116 = vadd.xlane.f32.xlu1 %v1115_v4  ;;  %v1609_v4 = vld [vmem:[#allocation10] sm:$0xff] }
 0x3d1   : > { %v2243_v5 = vpop.eup %2242 }
 0x3d2   : > { %v1281_v7 = vsel %vm870_vm2, %v2243_v5, 0.0 }
 0x3d3   : > { %1282 = vadd.xlane.f32.xlu0 %v1281_v7 }
 0x3e0   : > { %1286 = vrot.lane.b32.xlu1 %v2836_v36, %s2506_s11  ;;  %s3026_s11 = sld [smem:[#allocation30_spill]] }
 0x3e5   : > { %v955_v8 = vpop.xlane.xlu0 %954 }
 0x3e6   : > { %2244 = vrcp.f32 %v955_v8 }
 0x3e7   : > { %2246 = vpow2.f32 %v1444_v11 }
 0x3e9   : > { %1121 = vrot.lane.b32.xlu0 %v2836_v36, %s2507_s0  ;;  %s1824_s0 = scalar_lea.hbm %s3026_s11, %s1990_s24 }
 0x3f3   : > { %v2245_v12 = vpop.eup %2244 }
 0x3f4   : > { %v957_v13 = vmul.f32 %v2245_v12, %v2239_v59  ;;  %v2247_v14 = vpop.eup %2246 }
 0x3f5   : > { %v1446_v15 = vsel %vm870_vm2, %v2247_v14, 0.0 }
 0x3f6   : > { %2075 = vmatmul.mubr.msk.f32.vlgmr.msra.gmra.mxu1 %vm870_vm2, %v957_v13 }
 0x3f7   : > { %2084 = vmatprep.mubr.msk.f32.mxu1 %vm2505_vm1, %v2504_v6 }
 0x404   : > { %1447 = vadd.xlane.f32.xlu1 %v1446_v15 }
 0x415   : > { %1451 = vrot.lane.b32.xlu1 %v2836_v36, %s2508_s30  ;;  %s1813_s30 = scalar_lea.sflag [#allocation4], %s2766_s23 }
 0x458   : > { %v1117_v16 = vpop.xlane.xlu1 %1116 }
 0x459   : > { %2248 = vrcp.f32 %v1117_v16  ;;  %v1981_v16 = vld [vmem:[%s2973_s8] ss:$0 sm:$0xff] }
 0x45c   : > { %v1283_v17 = vpop.xlane.xlu0 %1282  ;;  %v1287_v21 = vpop.permute.xlu1 %1286 }
 0x45d   : > { %2250 = vrcp.f32 %v1283_v17 }
 0x460   : > { %v1122_v18 = vpop.permute.xlu0 %1121 }
 0x461   : > { %2083 = vmatpush3.msra.mxu1 %v1122_v18  ;;  %v1982_v18 = vld [vmem:[%s2974_s9] ss:$0 sm:$0xff] }
 0x462   : > { %2092 = vmatprep.subr.mxu1 %v2504_v6 }
 0x466   : > { %v2249_v19 = vpop.eup %2248 }
 0x467   : > { %v1119_v20 = vmul.f32 %v2249_v19, %v2241_v3  ;;  %v1610_v3 = vld [vmem:[#allocation10 + $0x8] sm:$0xff] }
 0x468   : > { %2112 = vmatpush3.msra.mxu0 %v1610_v3 }
 0x469   : > { %2085 = vmatmul.mubr.msk.f32.vlgmr.msra.gmra.mxu1 %vm870_vm2, %v1119_v20  ;;  %2113 = vmatprep.subr.mxu0 %v2504_v6 }
 0x46a   : > { %v2251_v22 = vpop.eup %2250  ;;  %2093 = vmatpush3.msra.mxu1 %v1287_v21  ;;  %2094 = vmatprep.mubr.msk.f32.mxu1 %vm2505_vm1, %v2504_v6  ;;  %v1696_v21 = vld [vmem:[#allocation11 + $0x10] sm:$0xff] }
 0x46b   : > { %v1285_v23 = vmul.f32 %v2251_v22, %v2243_v5  ;;  %2102 = vmatprep.subr.mxu1 %v2504_v6  ;;  %2114 = vmatpush3.msra.mxu0 %v1609_v4  ;;  %v1695_v22 = vld [vmem:[#allocation11 + $0x8] sm:$0xff] }
 0x46d   : > { %2095 = vmatmul.mubr.msk.f32.vlgmr.msra.gmra.mxu1 %vm870_vm2, %v1285_v23  ;;  %v1694_v23 = vld [vmem:[#allocation11] sm:$0xff] }
 0x46e   : > { %2104 = vmatprep.mubr.msk.f32.mxu1 %vm2505_vm1, %v2504_v6 }
 0x48d   : > { %v1448_v24 = vpop.xlane.xlu1 %1447 }
 0x48e   : > { %2252 = vrcp.f32 %v1448_v24  ;;  %v1983_v24 = vld [vmem:[%s2978_s13] ss:$0 sm:$0xff] }
 0x491   : > { %v1452_v25 = vpop.permute.xlu1 %1451 }
 0x492   : > { %2103 = vmatpush3.msra.mxu1 %v1452_v25 }
 0x493   : > { %2118 = vmatprep.subr.mxu1 %v2504_v6 }
 0x49b   : > { %v2253_v26 = vpop.eup %2252 }
 0x49c   : > { %v1450_v28 = vmul.f32 %v2253_v26, %v2247_v14 }
 0x49e   : > { %2105 = vmatmul.mubr.msk.f32.vlgmr.msra.gmra.mxu1 %vm870_vm2, %v1450_v28 }
 0x49f   : > { %2126 = vmatprep.mubr.msk.f32.mxu1 %vm2505_vm1, %v2504_v6 }
 0x4b6   : > { %v1027_v29 = vpop.f32.mrf.mxu1 }
 0x4b8   : > { %v2076_v30 = vpop.f32.mrf.mxu1 }
 0x4b9   : > { %v1985_v30 = vld [vmem:[%s2980_s15] ss:$0 sm:$0xff] }
 0x529   : > { %v1193_v31 = vpop.f32.mrf.mxu1 }
 0x52a   : > { %1528 = vrot.lane.b32.xlu0 %v1193_v31, %s2509_s16  ;;  %s2418_s16 = scalar_lea.vmem %s1827_s12, 128 }
 0x52b   : > { %v2086_v32 = vpop.f32.mrf.mxu1  ;;  %p2419_p8 = scmp.ne.s32.totalorder %s1827_s12, %s2418_s16 }
 0x52d   : > { %v1358_v33 = vpop.f32.mrf.mxu1  ;;  %p2420_p0 = pnand %p2419_p8, %p3027_p11 }
 0x52e   : > { %1532 = vrot.lane.b32.xlu1 %v1358_v33, %s2510_s20  ;;  %s2512_s20 = smov [#allocation13]  }
 0x52f   : > { %v2096_v34 = vpop.f32.mrf.mxu1  ;;  %p2421_p13 = pneg %p2420_p0  ;;  %s2422_s27 = sshll.u32 %s2512_s20, 4  ;;  %s2423_s27 = int_to_ptr.vmem [resolvable:$false] %s2422_s27 }
 0x530   : > { %s2424_s18 = scalar_lea.vmem %s2423_s27, 256  ;;  %p2425_p5 = scmp.lt.s32.totalorder %s1827_s12, %s2423_s27 }
 0x531   : > { %p2426_p9 = scmp.lt.s32.totalorder %s2424_s18, %s2418_s16 }
 0x533   : > { %p2427_p10 = por %p2426_p9, %p2425_p5 }
 0x535   : > { %p2428_p1 = pnand %p2427_p10, %p2421_p13 }
 0x55e   : > { %v1523_v35 = vpop.f32.mrf.mxu1 }
 0x55f   : > { %1536 = vrot.lane.b32.xlu0 %v1523_v35, %s2511_s17 }
 0x560   : > { %v2106_v36 = vpop.f32.mrf.mxu1 }
 0x59c   : > { %v1529_v37 = vpop.permute.xlu0 %1528 }
 0x59d   : > { %v1539_v39 = vsel %vm870_vm2, %v1027_v29, %v1529_v37 }
 0x5a0   : > { %v1533_v38 = vpop.permute.xlu1 %1532 }
 0x5a1   : > { %v1541_v40 = vsel %vm1540_vm3, %v1539_v39, %v1533_v38 }
 0x5d1   : > { %v1537_v41 = vpop.permute.xlu0 %1536 }
 0x5d2   : > { %v1543_v42 = vsel %vm1542_vm4, %v1541_v40, %v1537_v41 }
 0x5d3   : > { %v1546_v43 = vsel %vm613_vm0, %v1543_v42, 0.0  ;;  %v1550_v44 = vmul.f32 %v1543_v42, %v1543_v42 }
 0x5d4   : > { %1547 = vadd.xlane.f32.xlu1 %v1546_v43 }
 0x5d5   : > { %v1551_v45 = vsel %vm613_vm0, %v1550_v44, 0.0 }
 0x5d6   : > { %1552 = vadd.xlane.f32.xlu0 %v1551_v45 }
 0x65d   : > { %v1548_v46 = vpop.xlane.xlu1 %1547 }
 0x65e   : > { %v1549_v47 = vmul.f32 0.03125, %v1548_v46  ;;  %v1987_v46 = vld [vmem:[%s2975_s10] ss:$0 sm:$0xff] }
 0x65f   : > { %v1553_v48 = vpop.xlane.xlu0 %1552 }
 0x660   : > { %v1555_v49 = vmul.f32 %v1549_v47, %v1549_v47  ;;  %v1554_v50 = vmul.f32 0.03125, %v1553_v48  ;;  %v1558_v54 = vsub.f32 %v1543_v42, %v1549_v47  ;;  %v1988_v48 = vld [vmem:[%s3025_s19] ss:$0 sm:$0xff] }
 0x662   : > { %v1556_v51 = vsub.f32 %v1554_v50, %v1555_v49 }
 0x664   : > { %v1557_v52 = vmax.f32 %v1556_v51, 0.0 }
 0x666   : > { %v1559_v53 = vadd.f32 1e-05, %v1557_v52 }
 0x668   : > { %2254 = vrsqrt.f32 %v1559_v53 }
 0x675   : > { %v2255_v55 = vpop.eup %2254 }
 0x676   : > { %v1561_v57 = vmul.f32 %v2255_v55, %v1558_v54 }
 0x678   : > { %v1568_v59 = vmul.f32 %v1979_v56, %v1561_v57 }
 0x67a   : > { %v1575_v60 = vadd.f32 %v1980_v58, %v1568_v59 }
 0x67c   : > { %v1576_v61 = vadd.f32 %v1575_v60, %v2810_v27  ;;  %v1697_v27 = vld [vmem:[#allocation11 + $0x18] sm:$0xff] }
 0x67d   : > { %2119 = vmatpush3.msra.mxu1 %v1697_v27 }
 0x67e   : > { %v1579_v62 = vsel %vm613_vm0, %v1576_v61, 0.0  ;;  %v1583_v63 = vmul.f32 %v1576_v61, %v1576_v61  ;;  %2120 = vmatprep.subr.mxu1 %v2504_v6 }
 0x67f   : > { %1580 = vadd.xlane.f32.xlu0 %v1579_v62  ;;  %2121 = vmatpush3.msra.mxu1 %v1696_v21 }
 0x680   : > { %v1584_v0 = vsel %vm613_vm0, %v1583_v63, 0.0  ;;  %2122 = vmatprep.subr.mxu1 %v2504_v6 }
 0x681   : > { %1585 = vadd.xlane.f32.xlu1 %v1584_v0  ;;  %2123 = vmatpush3.msra.mxu1 %v1695_v22 }
 0x682   : > { %2124 = vmatprep.subr.mxu1 %v2504_v6 }
 0x683   : > { %2125 = vmatpush3.msra.mxu1 %v1694_v23 }
 0x708   : > { %v1581_v5 = vpop.xlane.xlu0 %1580 }
 0x709   : > { %v1582_v7 = vmul.f32 0.03125, %v1581_v5 }
 0x70a   : > { %v1586_v8 = vpop.xlane.xlu1 %1585 }
 0x70b   : > { %v1588_v9 = vmul.f32 %v1582_v7, %v1582_v7  ;;  %v1587_v10 = vmul.f32 0.03125, %v1586_v8  ;;  %v1591_v14 = vsub.f32 %v1576_v61, %v1582_v7 }
 0x70d   : > { %v1589_v11 = vsub.f32 %v1587_v10, %v1588_v9 }
 0x70f   : > { %v1590_v12 = vmax.f32 %v1589_v11, 0.0 }
 0x711   : > { %v1592_v13 = vadd.f32 1e-05, %v1590_v12 }
 0x713   : > { %2256 = vrsqrt.f32 %v1592_v13 }
 0x720   : > { %v2257_v15 = vpop.eup %2256 }
 0x721   : > { %v1594_v17 = vmul.f32 %v2257_v15, %v1591_v14 }
 0x723   : > { %v1601_v19 = vmul.f32 %v1981_v16, %v1594_v17 }
 0x725   : > { %v1608_v20 = vadd.f32 %v1982_v18, %v1601_v19 }
 0x727   : > { %2116 = vmatmul.mubr.msk.f32.vlgmr.msra.gmra.mxu0 %vm613_vm0, %v1608_v20 }
 0x7e7   : > { %v1689_v25 = vpop.f32.mrf.mxu0 }
 0x7e8   : > { %v1690_v26 = vadd.f32 %v1983_v24, %v1689_v25 }
 0x7e9   : > { %v2117_v28 = vpop.f32.mrf.mxu0 }
 0x7ea   : > { %v1693_v29 = vmax.f32 %v1690_v26, 0.0 }
 0x7ec   : > { %2127 = vmatmul.mubr.msk.f32.vlgmr.msra.gmra.mxu1 %vm613_vm0, %v1693_v29 }
 0x8ac   : > { %v1774_v31 = vpop.f32.mrf.mxu1 }
 0x8ad   : > { %v1775_v32 = vadd.f32 %v1985_v30, %v1774_v31 }
 0x8ae   : > { %v2128_v33 = vpop.f32.mrf.mxu1 }
 0x8af   : > { %v1780_v6 = vsel %vm613_vm0, %v1775_v32, 0.0  ;;  %v1784_v34 = vmul.f32 %v1775_v32, %v1775_v32 }
 0x8b0   : > { %1781 = vadd.xlane.f32.xlu0 %v1780_v6 }
 0x8b1   : > { %v1785_v35 = vsel %vm613_vm0, %v1784_v34, 0.0 }
 0x8b2   : > { %1786 = vadd.xlane.f32.xlu1 %v1785_v35 }
 0x939   : > { %v1782_v36 = vpop.xlane.xlu0 %1781 }
 0x93a   : > { %v1783_v37 = vmul.f32 0.03125, %v1782_v36 }
 0x93b   : > { %v1787_v38 = vpop.xlane.xlu1 %1786 }
 0x93c   : > { %v1789_v39 = vmul.f32 %v1783_v37, %v1783_v37  ;;  %v1788_v40 = vmul.f32 0.03125, %v1787_v38  ;;  %v1792_v44 = vsub.f32 %v1775_v32, %v1783_v37 }
 0x93e   : > { %v1790_v41 = vsub.f32 %v1788_v40, %v1789_v39 }
 0x940   : > { %v1791_v42 = vmax.f32 %v1790_v41, 0.0 }
 0x942   : > { %v1793_v43 = vadd.f32 1e-05, %v1791_v42 }
 0x944   : > { %2258 = vrsqrt.f32 %v1793_v43 }
 0x951   : > { %v2259_v45 = vpop.eup %2258 }
 0x952   : > { %v1795_v47 = vmul.f32 %v2259_v45, %v1792_v44 }
 0x954   : > { %v1802_v49 = vmul.f32 %v1987_v46, %v1795_v47 }
 0x956   : > { %v1809_v50 = vadd.f32 %v1988_v48, %v1802_v49 }
 0x958   : > { %v1810_v51 = vadd.f32 %v1809_v50, %v1608_v20 }
 0x95a   : > { %1811 = vst.msk [vmem:[%s609_s2] sm:$0xff] %vm613_vm0, %v1810_v51 }
 0x95b   : > { %2431 = shalt.err (!%p2428_p1)
}
 0x95c   : > { %s2432_s17 = scalar_lea.hbm %s1824_s0, 128  ;;  %s2436_s25 = scalar_lea.hbm %s3026_s11, 256 }
 0x95d   : > { %p2433_p3 = scmp.ne.s32.totalorder %s1824_s0, %s2432_s17  ;;  %p2437_p6 = scmp.lt.s32.totalorder %s1824_s0, %s3026_s11 }
 0x95e   : > { %p2438_p2 = scmp.lt.s32.totalorder %s2436_s25, %s2432_s17 }
 0x95f   : > { %p2434_p4 = pnand %p2433_p3, %p3027_p11 }
 0x960   : > { %p2439_p7 = por %p2438_p2, %p2437_p6 }
 0x961   : > { %p2435_p12 = pneg %p2434_p4 }
 0x963   : > { %p2440_p8 = pnand %p2439_p7, %p2435_p12 }
 0x965   : > { %2443 = shalt.err (!%p2440_p8)
}
 0x966   : > { %2151 = dma.vmem_to_hbm [thread:$0]  (%p3027_p11), %s1827_s12, 128, %s1824_s0, %s1813_s30  }
 0x967 PF: > { %s3028_s2 = sld [smem:[#allocation20_spill]]  ;;  %s1838_s14 = sand.u32 1, %s2482_s21  }
 0x968   : > { %p3029_p0 = scmp.ne.s32.totalorder %s3014_s29, 0  ;;  %s1839_s28 = scalar_lea.sflag [#allocation4], %s1838_s14 }
 0x96d   : > { %p3030_p13 = scmp.ge.s32.totalorder %s3028_s2, 2 }
 0x96f   : > { %p2174_p5 = pnand %p3030_p13, %p3029_p0 }
 0x971   : > { %p2175_p9 = pneg %p2174_p5 }
 0x973   : > { %2477 = dma.done.wait (%p2175_p9), %s1839_s28, 128  }
 0x974   : > { %2479 = vsyncadd (%p2175_p9), %s1839_s28, 4294967168  ;;  %s3031_s24 = sld [smem:[#allocation21_spill]]  ;;  %s3034_s21 = smov %s2486_s22 }
 0x975   : > { %s3032_s16 = sld [smem:[#allocation19_spill]] }
 0x976   : > { %s3033_s23 = sld [smem:[#allocation22_spill]] }
 0x97a   : > { %p32_p10 = scmp.ge.s32.totalorder %s3031_s24, 4  }
 0x97b   : > { %s3035_s22 = smov %s3032_s16 }
 0x97c   :  { %34 = sbr.rel (!%p32_p10) target bundleno = 17 (0x11), region = 149 }
 0x981   :  { %1844 = vsyncpa [#allocation3], 1 }
 0x982   :  { %1846 = vsyncpa [#allocation3 + $0x1], 1 }
 0x983   :  { %1847 = vsyncpa [#allocation6], 1 }
 0x984   :  { %1848 = vsyncpa [#allocation9], 1 }
 0x985   :  { %1849 = vsyncpa [#allocation12], 1 }
 0x986   :  { %1850 = vsyncpa [#allocation4], 1 }
 0x987   :  { %1852 = vsyncpa [#allocation4 + $0x1], 1 }

</bundles_post_ra>
